<compile_context>
chip_gen: v5e
topology: v5e:2x2
jax: 0.10.0
libtpu: 0.0.40
codegen_flags: <defaults>
</compile_context>

<pallas_src>
import jax
import jax.numpy as jnp
import numpy as np
from jax.experimental import pallas as pl
from jax.experimental.pallas import tpu as pltpu

# ---- problem sizes (small, consistent with the module) ----------------------
B = 2            # batch
S = 8            # seq_len (power of two -> 3-stage skew butterfly)
H = 4            # heads
C = 32           # n_state
D = C // H       # depth per head
PF = 64          # proj_forward
MAX_SEQ = 16     # max_sequence
EPS = 1e-5
SCALE = 1.0 / float(D) ** 0.5
NEG_INF = -1e9

assert S & (S - 1) == 0, "skew butterfly assumes power-of-two seq_len"


# ---------------------------------------------------------------------------
# Single fused kernel: whole decoder block for the whole (folded) batch.
# ---------------------------------------------------------------------------
def _decoder_block_kernel(x_ref, mask_ref, wattn_ref, wproj_ref, e_ref,
                          w1_ref, w2_ref, vecs_ref, o_ref):
    f32 = jnp.float32
    x = x_ref[...]                                                   # (B*S, C)

    # ---- unpack the consolidated 1-D parameter buffer (4, 3C) ---------------
    vecs = vecs_ref[...]
    battn = vecs[0:1, :]                                             # (1, 3C)
    b1 = vecs[1:2, :PF]                                              # (1, PF)
    bproj = vecs[2:3, 0 * C:1 * C]
    g1 = vecs[2:3, 1 * C:2 * C]
    be1 = vecs[2:3, 2 * C:3 * C]
    b2 = vecs[3:4, 0 * C:1 * C]
    g2 = vecs[3:4, 1 * C:2 * C]
    be2 = vecs[3:4, 2 * C:3 * C]

    # ---- fused qkv projection over all B*S rows (one MXU pass) --------------
    c = jnp.dot(x, wattn_ref[...], preferred_element_type=f32) + battn
    q = c[:, :C] * SCALE            # pre-scale q once: (qk^T + qE^T)*scale
    k = c[:, C:2 * C]
    v = c[:, 2 * C:]

    # ---- split heads: (B*S, C) -> (H, B*S, D) with head as leading batch ----
    # (slice+stack kept deliberately: known-good lowering at these sub-tile
    #  sizes; cost is small after the other changes.)
    def split_heads(t):
        return jnp.concatenate(
            [t[:, h * D:(h + 1) * D][None, :, :] for h in range(H)], axis=0)

    qh, kh, vh = split_heads(q), split_heads(k), split_heads(v)      # (H, BS, D)

    # ---- fused scores + relative logits: ONE batched matmul vs [K ; E] ------
    khe = jnp.concatenate([kh, e_ref[...]], axis=1)                  # (H, BS+S, D)
    se = jnp.einsum('hqd,hkd->hqk', qh, khe,
                    preferred_element_type=f32)                      # (H, BS, BS+S)
    scores = se[:, :, :B * S]                                        # (H, BS, BS)
    rel_raw = se[:, :, B * S:]                                       # (H, BS, S)

    # ---- relative-position "skew", 3-stage conditional-rotate butterfly -----
    # Desired: skewed[h, r, j] = rel_raw[h, r, (j - (r % S) - 1) mod S] on the
    # causal region j <= r%S (the rest is killed by the mask, exactly as in
    # the reference's pad/reshape trick).  Per-row rotation amount
    # amt = ((r % S) + 1) % S is applied via its binary decomposition.
    # TODO(synk): assumes the supplied mask strongly suppresses all j > i
    # positions (strictly causal) — the only regime the skew trick is valid in.
    r_idx = jax.lax.broadcasted_iota(jnp.int32, rel_raw.shape, 1)    # (H, BS, S)
    amt = ((r_idx & (S - 1)) + 1) & (S - 1)

    def roll_right(t, s):           # circular roll along last axis (static s)
        return jnp.concatenate([t[..., S - s:], t[..., :S - s]], axis=-1)

    skewed = rel_raw
    bit = 1
    while bit < S:
        skewed = jnp.where((amt & bit) != 0, roll_right(skewed, bit), skewed)
        bit *= 2

    # Tile along the key axis so each batch's diagonal block picks up its own
    # (BS, S) slab; off-block values are masked away by the block-diag mask.
    rel_full = jnp.concatenate([skewed] * B, axis=-1)                # (H, BS, BS)

    logits = scores + rel_full + mask_ref[...][None, :, :]           # (H, BS, BS)

    # ---- softmax (f32); divide moved to the EUP via approx reciprocal -------
    m = jnp.max(logits, axis=-1, keepdims=True)
    p = jnp.exp(logits - m)
    w = p * pl.reciprocal(jnp.sum(p, axis=-1, keepdims=True), approx=True)

    # ---- attention @ v, combine heads, single c_proj matmul -----------------
    a = jnp.einsum('hqk,hkd->hqd', w, vh, preferred_element_type=f32)  # (H, BS, D)
    a_comb = jnp.concatenate([a[h] for h in range(H)], axis=-1)        # (BS, C)
    attn_out = jnp.dot(a_comb, wproj_ref[...],
                       preferred_element_type=f32) + bproj             # (BS, C)

    # ---- residual + LayerNorm1 (dropout = identity in eval mode) ------------
    def layer_norm(t, g, be):
        mu = jnp.mean(t, axis=-1, keepdims=True)
        var = jnp.mean((t - mu) ** 2, axis=-1, keepdims=True)
        return (t - mu) * jax.lax.rsqrt(var + EPS) * g + be

    xn = layer_norm(attn_out + x, g1, be1)

    # ---- feed-forward (activation = ReLU), all rows in one MXU pass each ----
    h1 = jnp.dot(xn, w1_ref[...], preferred_element_type=f32) + b1
    h1 = jnp.maximum(h1, 0.0)
    h2 = jnp.dot(h1, w2_ref[...], preferred_element_type=f32) + b2

    # ---- residual + LayerNorm2, direct (B*S, C) store ------------------------
    o_ref[...] = layer_norm(xn + h2, g2, be2)


# ---------------------------------------------------------------------------
# Wrapper
# ---------------------------------------------------------------------------
def decoder_block_forward(x, mask, params):
    (wattn, battn, wproj, bproj, E, g1, be1, w1, b1, w2, b2, g2, be2) = params

    E_sl = E[:, MAX_SEQ - S:, :]                      # (H, S, D) relative embeddings
    x2 = x.reshape(B * S, C)                          # fold batch into rows

    # Block-diagonal causal mask over the folded batch dim: within-batch blocks
    # carry the user mask, cross-batch positions are hard-masked.
    r = jnp.arange(B * S)
    same_block = (r[:, None] // S) == (r[None, :] // S)
    big_mask = jnp.where(same_block, jnp.tile(mask, (B, B)),
                         NEG_INF).astype(jnp.float32)

    # Pack the eight small 1-D params into a single (4, 3C) VMEM operand.
    pad = lambda vct, n: jnp.pad(vct, (0, n - vct.shape[0]))
    vecs = jnp.stack([
        battn,                                        # row 0: (3C,)
        pad(b1, 3 * C),                               # row 1: b1 padded
        jnp.concatenate([bproj, g1, be1]),            # row 2
        jnp.concatenate([b2, g2, be2]),               # row 3
    ])

    vmem = pltpu.MemorySpace.VMEM
    out = pl.pallas_call(
        _decoder_block_kernel,
        out_shape=jax.ShapeDtypeStruct((B * S, C), jnp.float32),
        in_specs=[pl.BlockSpec(memory_space=vmem)] * 8,
        out_specs=pl.BlockSpec(memory_space=vmem),
    )(x2, big_mask, wattn, wproj, E_sl, w1, w2, vecs)

    return out.reshape(B, S, C)


# ---------------------------------------------------------------------------
# Pure-JAX reference (mirrors the PyTorch forward exactly) for verification.
# ---------------------------------------------------------------------------
def reference_forward(x, mask, params):
    (wattn, battn, wproj, bproj, E, g1, be1, w1, b1, w2, b2, g2, be2) = params
    c = x @ wattn + battn
    q, k, v = c[..., :C], c[..., C:2 * C], c[..., 2 * C:]
    split = lambda t: t.reshape(B, S, H, D).transpose(0, 2, 1, 3)
    q, k, v = split(q), split(k), split(v)
    w = q @ jnp.swapaxes(k, -1, -2)
    q_ = q.transpose(1, 0, 2, 3).reshape(H, B * S, D)
    E_sl = E[:, MAX_SEQ - S:]
    rel = q_ @ jnp.swapaxes(E_sl, -1, -2)
    rel = rel.reshape(H, B, S, S)
    rel = jnp.pad(rel, ((0, 0), (0, 0), (0, 0), (1, 0)))
    rel = rel.reshape(H, B, S + 1, S)[:, :, 1:]
    rel = rel.transpose(1, 0, 2, 3)
    w = (w + rel) * SCALE + mask
    w = jax.nn.softmax(w, axis=-1)
    a = (w @ v).transpose(0, 2, 1, 3).reshape(B, S, C)
    a = a @ wproj + bproj

    def ln(t, g, be):
        mu = t.mean(-1, keepdims=True)
        var = ((t - mu) ** 2).mean(-1, keepdims=True)
        return (t - mu) * jax.lax.rsqrt(var + EPS) * g + be

    xn = ln(a + x, g1, be1)
    h1 = jax.nn.relu(xn @ w1 + b1)
    h2 = h1 @ w2 + b2
    return ln(xn + h2, g2, be2)


if __name__ == "__main__":
    key = jax.random.PRNGKey(0)
    ks = jax.random.split(key, 8)
    f32 = jnp.float32

    # deterministic synthetic parameters (shapes from the module __init__)
    wattn = 0.02 * jax.random.normal(ks[0], (C, 3 * C), f32)
    battn = jnp.zeros((3 * C,), f32)
    wproj = 0.02 * jax.random.normal(ks[1], (C, C), f32)
    bproj = jnp.zeros((C,), f32)
    E = (2.0 / (MAX_SEQ + D)) ** 0.5 * jax.random.normal(ks[2], (H, MAX_SEQ, D), f32)
    g1, be1 = jnp.ones((C,), f32), jnp.zeros((C,), f32)
    w1 = (1.0 / C ** 0.5) * jax.random.normal(ks[3], (C, PF), f32)
    b1 = 0.01 * jax.random.normal(ks[4], (PF,), f32)
    w2 = (1.0 / PF ** 0.5) * jax.random.normal(ks[5], (PF, C), f32)
    b2 = 0.01 * jax.random.normal(ks[6], (C,), f32)
    g2, be2 = jnp.ones((C,), f32), jnp.zeros((C,), f32)
    params = (wattn, battn, wproj, bproj, E, g1, be1, w1, b1, w2, b2, g2, be2)

    # inputs
    x = jax.random.normal(ks[7], (B, S, C), f32)
    idx = jnp.arange(S)
    mask = jnp.where(idx[:, None] >= idx[None, :], 0.0, NEG_INF).astype(f32)  # causal

    fwd = jax.jit(decoder_block_forward)
    out = jax.block_until_ready(fwd(x, mask, params))

    ref = reference_forward(x, mask, params)
    np.testing.assert_allclose(np.asarray(out), np.asarray(ref), rtol=1e-3, atol=1e-3)

    print("KERNEL_OK")
</pallas_src>

<mosaic_0001>
module attributes {stable_mosaic.version = 11 : i64} {
  func.func @_decoder_block_kernel(%arg0: memref<16x32xf32, #tpu.memory_space<vmem>>, %arg1: memref<16x16xf32, #tpu.memory_space<vmem>>, %arg2: memref<32x96xf32, #tpu.memory_space<vmem>>, %arg3: memref<32x32xf32, #tpu.memory_space<vmem>>, %arg4: memref<4x8x8xf32, #tpu.memory_space<vmem>>, %arg5: memref<32x64xf32, #tpu.memory_space<vmem>>, %arg6: memref<64x32xf32, #tpu.memory_space<vmem>>, %arg7: memref<4x96xf32, #tpu.memory_space<vmem>>, %arg8: memref<16x32xf32, #tpu.memory_space<vmem>>) attributes {dimension_semantics = [], scalar_prefetch = 0 : i64, scratch_operands = 0 : i64, tpu.core_type = #tpu.core_type<tc>} {
    %c0 = arith.constant 0 : index
    %c0_0 = arith.constant 0 : index
    %0 = vector.load %arg0[%c0, %c0_0] : memref<16x32xf32, #tpu.memory_space<vmem>>, vector<16x32xf32>
    %c0_1 = arith.constant 0 : index
    %c0_2 = arith.constant 0 : index
    %1 = vector.load %arg7[%c0_1, %c0_2] : memref<4x96xf32, #tpu.memory_space<vmem>>, vector<4x96xf32>
    %2 = vector.extract_strided_slice %1 {offsets = [0, 0], sizes = [1, 96], strides = [1, 1]} : vector<4x96xf32> to vector<1x96xf32>
    %3 = vector.extract_strided_slice %1 {offsets = [1, 0], sizes = [1, 64], strides = [1, 1]} : vector<4x96xf32> to vector<1x64xf32>
    %4 = vector.extract_strided_slice %1 {offsets = [2, 0], sizes = [1, 32], strides = [1, 1]} : vector<4x96xf32> to vector<1x32xf32>
    %5 = vector.extract_strided_slice %1 {offsets = [2, 32], sizes = [1, 32], strides = [1, 1]} : vector<4x96xf32> to vector<1x32xf32>
    %6 = vector.extract_strided_slice %1 {offsets = [2, 64], sizes = [1, 32], strides = [1, 1]} : vector<4x96xf32> to vector<1x32xf32>
    %7 = vector.extract_strided_slice %1 {offsets = [3, 0], sizes = [1, 32], strides = [1, 1]} : vector<4x96xf32> to vector<1x32xf32>
    %8 = vector.extract_strided_slice %1 {offsets = [3, 32], sizes = [1, 32], strides = [1, 1]} : vector<4x96xf32> to vector<1x32xf32>
    %9 = vector.extract_strided_slice %1 {offsets = [3, 64], sizes = [1, 32], strides = [1, 1]} : vector<4x96xf32> to vector<1x32xf32>
    %c0_3 = arith.constant 0 : index
    %c0_4 = arith.constant 0 : index
    %10 = vector.load %arg2[%c0_3, %c0_4] : memref<32x96xf32, #tpu.memory_space<vmem>>, vector<32x96xf32>
    %cst = arith.constant dense<0.000000e+00> : vector<16x96xf32>
    %11 = tpu.matmul %0, %10, %cst {dimension_numbers = #tpu.dot_dimension_numbers<[1], [0], [0], [1], [0, 0, 1, 1], [], []>} : vector<16x32xf32>, vector<32x96xf32>, vector<16x96xf32> -> vector<16x96xf32>
    %12 = vector.broadcast %2 : vector<1x96xf32> to vector<16x96xf32>
    %13 = arith.addf %11, %12 : vector<16x96xf32>
    %14 = vector.extract_strided_slice %13 {offsets = [0, 0], sizes = [16, 32], strides = [1, 1]} : vector<16x96xf32> to vector<16x32xf32>
    %cst_5 = arith.constant 0.353553385 : f32
    %15 = vector.broadcast %cst_5 : f32 to vector<16x32xf32>
    %16 = arith.mulf %14, %15 : vector<16x32xf32>
    %17 = vector.extract_strided_slice %13 {offsets = [0, 32], sizes = [16, 32], strides = [1, 1]} : vector<16x96xf32> to vector<16x32xf32>
    %18 = vector.extract_strided_slice %13 {offsets = [0, 64], sizes = [16, 32], strides = [1, 1]} : vector<16x96xf32> to vector<16x32xf32>
    %19 = vector.extract_strided_slice %16 {offsets = [0, 0], sizes = [16, 8], strides = [1, 1]} : vector<16x32xf32> to vector<16x8xf32>
    %20 = vector.shape_cast %19 : vector<16x8xf32> to vector<1x16x8xf32>
    %21 = vector.extract_strided_slice %16 {offsets = [0, 8], sizes = [16, 8], strides = [1, 1]} : vector<16x32xf32> to vector<16x8xf32>
    %22 = vector.shape_cast %21 : vector<16x8xf32> to vector<1x16x8xf32>
    %23 = vector.extract_strided_slice %16 {offsets = [0, 16], sizes = [16, 8], strides = [1, 1]} : vector<16x32xf32> to vector<16x8xf32>
    %24 = vector.shape_cast %23 : vector<16x8xf32> to vector<1x16x8xf32>
    %25 = vector.extract_strided_slice %16 {offsets = [0, 24], sizes = [16, 8], strides = [1, 1]} : vector<16x32xf32> to vector<16x8xf32>
    %26 = vector.shape_cast %25 : vector<16x8xf32> to vector<1x16x8xf32>
    %27 = tpu.concatenate %20, %22, %24, %26 in 0 : vector<1x16x8xf32>, vector<1x16x8xf32>, vector<1x16x8xf32>, vector<1x16x8xf32> -> vector<4x16x8xf32>
    %28 = vector.extract_strided_slice %17 {offsets = [0, 0], sizes = [16, 8], strides = [1, 1]} : vector<16x32xf32> to vector<16x8xf32>
    %29 = vector.shape_cast %28 : vector<16x8xf32> to vector<1x16x8xf32>
    %30 = vector.extract_strided_slice %17 {offsets = [0, 8], sizes = [16, 8], strides = [1, 1]} : vector<16x32xf32> to vector<16x8xf32>
    %31 = vector.shape_cast %30 : vector<16x8xf32> to vector<1x16x8xf32>
    %32 = vector.extract_strided_slice %17 {offsets = [0, 16], sizes = [16, 8], strides = [1, 1]} : vector<16x32xf32> to vector<16x8xf32>
    %33 = vector.shape_cast %32 : vector<16x8xf32> to vector<1x16x8xf32>
    %34 = vector.extract_strided_slice %17 {offsets = [0, 24], sizes = [16, 8], strides = [1, 1]} : vector<16x32xf32> to vector<16x8xf32>
    %35 = vector.shape_cast %34 : vector<16x8xf32> to vector<1x16x8xf32>
    %36 = tpu.concatenate %29, %31, %33, %35 in 0 : vector<1x16x8xf32>, vector<1x16x8xf32>, vector<1x16x8xf32>, vector<1x16x8xf32> -> vector<4x16x8xf32>
    %37 = vector.extract_strided_slice %18 {offsets = [0, 0], sizes = [16, 8], strides = [1, 1]} : vector<16x32xf32> to vector<16x8xf32>
    %38 = vector.shape_cast %37 : vector<16x8xf32> to vector<1x16x8xf32>
    %39 = vector.extract_strided_slice %18 {offsets = [0, 8], sizes = [16, 8], strides = [1, 1]} : vector<16x32xf32> to vector<16x8xf32>
    %40 = vector.shape_cast %39 : vector<16x8xf32> to vector<1x16x8xf32>
    %41 = vector.extract_strided_slice %18 {offsets = [0, 16], sizes = [16, 8], strides = [1, 1]} : vector<16x32xf32> to vector<16x8xf32>
    %42 = vector.shape_cast %41 : vector<16x8xf32> to vector<1x16x8xf32>
    %43 = vector.extract_strided_slice %18 {offsets = [0, 24], sizes = [16, 8], strides = [1, 1]} : vector<16x32xf32> to vector<16x8xf32>
    %44 = vector.shape_cast %43 : vector<16x8xf32> to vector<1x16x8xf32>
    %45 = tpu.concatenate %38, %40, %42, %44 in 0 : vector<1x16x8xf32>, vector<1x16x8xf32>, vector<1x16x8xf32>, vector<1x16x8xf32> -> vector<4x16x8xf32>
    %c0_6 = arith.constant 0 : index
    %c0_7 = arith.constant 0 : index
    %c0_8 = arith.constant 0 : index
    %46 = vector.load %arg4[%c0_6, %c0_7, %c0_8] : memref<4x8x8xf32, #tpu.memory_space<vmem>>, vector<4x8x8xf32>
    %47 = tpu.concatenate %36, %46 in 1 : vector<4x16x8xf32>, vector<4x8x8xf32> -> vector<4x24x8xf32>
    "tpu.trace_start"() <{level = 10 : i32, message = "hqd,hkd->hqk"}> : () -> ()
    %cst_9 = arith.constant dense<0.000000e+00> : vector<4x16x24xf32>
    %48 = tpu.matmul %27, %47, %cst_9 {dimension_numbers = #tpu.dot_dimension_numbers<[2], [2], [1], [1], [0, 0, 0, 1, 1, 1], [0], [0]>} : vector<4x16x8xf32>, vector<4x24x8xf32>, vector<4x16x24xf32> -> vector<4x16x24xf32>
    "tpu.trace_stop"() : () -> ()
    %49 = vector.extract_strided_slice %48 {offsets = [0, 0, 0], sizes = [4, 16, 16], strides = [1, 1, 1]} : vector<4x16x24xf32> to vector<4x16x16xf32>
    %50 = vector.extract_strided_slice %48 {offsets = [0, 0, 16], sizes = [4, 16, 8], strides = [1, 1, 1]} : vector<4x16x24xf32> to vector<4x16x8xf32>
    %51 = tpu.iota {dimensions = array<i32: 1>} : vector<4x16x8xi32>
    %c7_i32 = arith.constant 7 : i32
    %52 = vector.broadcast %c7_i32 : i32 to vector<4x16x8xi32>
    %53 = arith.andi %51, %52 : vector<4x16x8xi32>
    %c1_i32 = arith.constant 1 : i32
    %54 = vector.broadcast %c1_i32 : i32 to vector<4x16x8xi32>
    %55 = arith.addi %53, %54 : vector<4x16x8xi32>
    %c7_i32_10 = arith.constant 7 : i32
    %56 = vector.broadcast %c7_i32_10 : i32 to vector<4x16x8xi32>
    %57 = arith.andi %55, %56 : vector<4x16x8xi32>
    %c1_i32_11 = arith.constant 1 : i32
    %58 = vector.broadcast %c1_i32_11 : i32 to vector<4x16x8xi32>
    %59 = arith.andi %57, %58 : vector<4x16x8xi32>
    %c0_i32 = arith.constant 0 : i32
    %60 = vector.broadcast %c0_i32 : i32 to vector<4x16x8xi32>
    %61 = arith.cmpi ne, %59, %60 : vector<4x16x8xi32>
    %62 = vector.extract_strided_slice %50 {offsets = [0, 0, 7], sizes = [4, 16, 1], strides = [1, 1, 1]} : vector<4x16x8xf32> to vector<4x16x1xf32>
    %63 = vector.extract_strided_slice %50 {offsets = [0, 0, 0], sizes = [4, 16, 7], strides = [1, 1, 1]} : vector<4x16x8xf32> to vector<4x16x7xf32>
    %64 = tpu.concatenate %62, %63 in 2 : vector<4x16x1xf32>, vector<4x16x7xf32> -> vector<4x16x8xf32>
    %65 = arith.select %61, %64, %50 : vector<4x16x8xi1>, vector<4x16x8xf32>
    %c2_i32 = arith.constant 2 : i32
    %66 = vector.broadcast %c2_i32 : i32 to vector<4x16x8xi32>
    %67 = arith.andi %57, %66 : vector<4x16x8xi32>
    %c0_i32_12 = arith.constant 0 : i32
    %68 = vector.broadcast %c0_i32_12 : i32 to vector<4x16x8xi32>
    %69 = arith.cmpi ne, %67, %68 : vector<4x16x8xi32>
    %70 = vector.extract_strided_slice %65 {offsets = [0, 0, 6], sizes = [4, 16, 2], strides = [1, 1, 1]} : vector<4x16x8xf32> to vector<4x16x2xf32>
    %71 = vector.extract_strided_slice %65 {offsets = [0, 0, 0], sizes = [4, 16, 6], strides = [1, 1, 1]} : vector<4x16x8xf32> to vector<4x16x6xf32>
    %72 = tpu.concatenate %70, %71 in 2 : vector<4x16x2xf32>, vector<4x16x6xf32> -> vector<4x16x8xf32>
    %73 = arith.select %69, %72, %65 : vector<4x16x8xi1>, vector<4x16x8xf32>
    %c4_i32 = arith.constant 4 : i32
    %74 = vector.broadcast %c4_i32 : i32 to vector<4x16x8xi32>
    %75 = arith.andi %57, %74 : vector<4x16x8xi32>
    %c0_i32_13 = arith.constant 0 : i32
    %76 = vector.broadcast %c0_i32_13 : i32 to vector<4x16x8xi32>
    %77 = arith.cmpi ne, %75, %76 : vector<4x16x8xi32>
    %78 = vector.extract_strided_slice %73 {offsets = [0, 0, 4], sizes = [4, 16, 4], strides = [1, 1, 1]} : vector<4x16x8xf32> to vector<4x16x4xf32>
    %79 = vector.extract_strided_slice %73 {offsets = [0, 0, 0], sizes = [4, 16, 4], strides = [1, 1, 1]} : vector<4x16x8xf32> to vector<4x16x4xf32>
    %80 = tpu.concatenate %78, %79 in 2 : vector<4x16x4xf32>, vector<4x16x4xf32> -> vector<4x16x8xf32>
    %81 = arith.select %77, %80, %73 : vector<4x16x8xi1>, vector<4x16x8xf32>
    %82 = tpu.concatenate %81, %81 in 2 : vector<4x16x8xf32>, vector<4x16x8xf32> -> vector<4x16x16xf32>
    %83 = arith.addf %49, %82 : vector<4x16x16xf32>
    %c0_14 = arith.constant 0 : index
    %c0_15 = arith.constant 0 : index
    %84 = vector.load %arg1[%c0_14, %c0_15] : memref<16x16xf32, #tpu.memory_space<vmem>>, vector<16x16xf32>
    %85 = vector.shape_cast %84 : vector<16x16xf32> to vector<1x16x16xf32>
    %86 = vector.broadcast %85 : vector<1x16x16xf32> to vector<4x16x16xf32>
    %87 = arith.addf %83, %86 : vector<4x16x16xf32>
    %cst_16 = arith.constant dense<0xFF800000> : vector<4x16xf32>
    %88 = vector.multi_reduction <maximumf>, %87, %cst_16 [2] : vector<4x16x16xf32> to vector<4x16xf32>
    %89 = vector.shape_cast %88 : vector<4x16xf32> to vector<4x16x1xf32>
    %90 = vector.broadcast %89 : vector<4x16x1xf32> to vector<4x16x16xf32>
    %91 = arith.subf %87, %90 : vector<4x16x16xf32>
    %92 = math.exp %91 : vector<4x16x16xf32>
    %cst_17 = arith.constant dense<0.000000e+00> : vector<4x16xf32>
    %93 = vector.multi_reduction <add>, %92, %cst_17 [2] : vector<4x16x16xf32> to vector<4x16xf32>
    %94 = vector.shape_cast %93 : vector<4x16xf32> to vector<4x16x1xf32>
    %95 = tpu.reciprocal %94 {approx = true} : vector<4x16x1xf32> -> vector<4x16x1xf32>
    %96 = vector.broadcast %95 : vector<4x16x1xf32> to vector<4x16x16xf32>
    %97 = arith.mulf %92, %96 : vector<4x16x16xf32>
    "tpu.trace_start"() <{level = 10 : i32, message = "hqk,hkd->hqd"}> : () -> ()
    %cst_18 = arith.constant dense<0.000000e+00> : vector<4x16x8xf32>
    %98 = tpu.matmul %97, %45, %cst_18 {dimension_numbers = #tpu.dot_dimension_numbers<[2], [1], [1], [2], [0, 0, 0, 1, 1, 2], [0], [0]>} : vector<4x16x16xf32>, vector<4x16x8xf32>, vector<4x16x8xf32> -> vector<4x16x8xf32>
    "tpu.trace_stop"() : () -> ()
    %99 = vector.extract_strided_slice %98 {offsets = [0, 0, 0], sizes = [1, 16, 8], strides = [1, 1, 1]} : vector<4x16x8xf32> to vector<1x16x8xf32>
    %100 = vector.shape_cast %99 : vector<1x16x8xf32> to vector<16x8xf32>
    %101 = vector.extract_strided_slice %98 {offsets = [1, 0, 0], sizes = [1, 16, 8], strides = [1, 1, 1]} : vector<4x16x8xf32> to vector<1x16x8xf32>
    %102 = vector.shape_cast %101 : vector<1x16x8xf32> to vector<16x8xf32>
    %103 = vector.extract_strided_slice %98 {offsets = [2, 0, 0], sizes = [1, 16, 8], strides = [1, 1, 1]} : vector<4x16x8xf32> to vector<1x16x8xf32>
    %104 = vector.shape_cast %103 : vector<1x16x8xf32> to vector<16x8xf32>
    %105 = vector.extract_strided_slice %98 {offsets = [3, 0, 0], sizes = [1, 16, 8], strides = [1, 1, 1]} : vector<4x16x8xf32> to vector<1x16x8xf32>
    %106 = vector.shape_cast %105 : vector<1x16x8xf32> to vector<16x8xf32>
    %107 = tpu.concatenate %100, %102, %104, %106 in 1 : vector<16x8xf32>, vector<16x8xf32>, vector<16x8xf32>, vector<16x8xf32> -> vector<16x32xf32>
    %c0_19 = arith.constant 0 : index
    %c0_20 = arith.constant 0 : index
    %108 = vector.load %arg3[%c0_19, %c0_20] : memref<32x32xf32, #tpu.memory_space<vmem>>, vector<32x32xf32>
    %cst_21 = arith.constant dense<0.000000e+00> : vector<16x32xf32>
    %109 = tpu.matmul %107, %108, %cst_21 {dimension_numbers = #tpu.dot_dimension_numbers<[1], [0], [0], [1], [0, 0, 1, 1], [], []>} : vector<16x32xf32>, vector<32x32xf32>, vector<16x32xf32> -> vector<16x32xf32>
    %110 = vector.broadcast %4 : vector<1x32xf32> to vector<16x32xf32>
    %111 = arith.addf %109, %110 : vector<16x32xf32>
    %112 = arith.addf %111, %0 : vector<16x32xf32>
    %cst_22 = arith.constant dense<0.000000e+00> : vector<16xf32>
    %113 = vector.multi_reduction <add>, %112, %cst_22 [1] : vector<16x32xf32> to vector<16xf32>
    %114 = vector.shape_cast %113 : vector<16xf32> to vector<16x1xf32>
    %cst_23 = arith.constant 3.200000e+01 : f32
    %115 = vector.broadcast %cst_23 : f32 to vector<16x1xf32>
    %116 = arith.divf %114, %115 : vector<16x1xf32>
    %117 = vector.broadcast %116 : vector<16x1xf32> to vector<16x32xf32>
    %118 = arith.subf %112, %117 : vector<16x32xf32>
    %119 = arith.mulf %118, %118 : vector<16x32xf32>
    %cst_24 = arith.constant dense<0.000000e+00> : vector<16xf32>
    %120 = vector.multi_reduction <add>, %119, %cst_24 [1] : vector<16x32xf32> to vector<16xf32>
    %121 = vector.shape_cast %120 : vector<16xf32> to vector<16x1xf32>
    %cst_25 = arith.constant 3.200000e+01 : f32
    %122 = vector.broadcast %cst_25 : f32 to vector<16x1xf32>
    %123 = arith.divf %121, %122 : vector<16x1xf32>
    %124 = vector.broadcast %116 : vector<16x1xf32> to vector<16x32xf32>
    %125 = arith.subf %112, %124 : vector<16x32xf32>
    %cst_26 = arith.constant 9.99999974E-6 : f32
    %126 = vector.broadcast %cst_26 : f32 to vector<16x1xf32>
    %127 = arith.addf %123, %126 : vector<16x1xf32>
    %128 = math.rsqrt %127 : vector<16x1xf32>
    %129 = vector.broadcast %128 : vector<16x1xf32> to vector<16x32xf32>
    %130 = arith.mulf %125, %129 : vector<16x32xf32>
    %131 = vector.broadcast %5 : vector<1x32xf32> to vector<16x32xf32>
    %132 = arith.mulf %130, %131 : vector<16x32xf32>
    %133 = vector.broadcast %6 : vector<1x32xf32> to vector<16x32xf32>
    %134 = arith.addf %132, %133 : vector<16x32xf32>
    %c0_27 = arith.constant 0 : index
    %c0_28 = arith.constant 0 : index
    %135 = vector.load %arg5[%c0_27, %c0_28] : memref<32x64xf32, #tpu.memory_space<vmem>>, vector<32x64xf32>
    %cst_29 = arith.constant dense<0.000000e+00> : vector<16x64xf32>
    %136 = tpu.matmul %134, %135, %cst_29 {dimension_numbers = #tpu.dot_dimension_numbers<[1], [0], [0], [1], [0, 0, 1, 1], [], []>} : vector<16x32xf32>, vector<32x64xf32>, vector<16x64xf32> -> vector<16x64xf32>
    %137 = vector.broadcast %3 : vector<1x64xf32> to vector<16x64xf32>
    %138 = arith.addf %136, %137 : vector<16x64xf32>
    %cst_30 = arith.constant 0.000000e+00 : f32
    %139 = vector.broadcast %cst_30 : f32 to vector<16x64xf32>
    %140 = arith.maximumf %138, %139 : vector<16x64xf32>
    %c0_31 = arith.constant 0 : index
    %c0_32 = arith.constant 0 : index
    %141 = vector.load %arg6[%c0_31, %c0_32] : memref<64x32xf32, #tpu.memory_space<vmem>>, vector<64x32xf32>
    %cst_33 = arith.constant dense<0.000000e+00> : vector<16x32xf32>
    %142 = tpu.matmul %140, %141, %cst_33 {dimension_numbers = #tpu.dot_dimension_numbers<[1], [0], [0], [1], [0, 0, 1, 1], [], []>} : vector<16x64xf32>, vector<64x32xf32>, vector<16x32xf32> -> vector<16x32xf32>
    %143 = vector.broadcast %7 : vector<1x32xf32> to vector<16x32xf32>
    %144 = arith.addf %142, %143 : vector<16x32xf32>
    %145 = arith.addf %134, %144 : vector<16x32xf32>
    %cst_34 = arith.constant dense<0.000000e+00> : vector<16xf32>
    %146 = vector.multi_reduction <add>, %145, %cst_34 [1] : vector<16x32xf32> to vector<16xf32>
    %147 = vector.shape_cast %146 : vector<16xf32> to vector<16x1xf32>
    %cst_35 = arith.constant 3.200000e+01 : f32
    %148 = vector.broadcast %cst_35 : f32 to vector<16x1xf32>
    %149 = arith.divf %147, %148 : vector<16x1xf32>
    %150 = vector.broadcast %149 : vector<16x1xf32> to vector<16x32xf32>
    %151 = arith.subf %145, %150 : vector<16x32xf32>
    %152 = arith.mulf %151, %151 : vector<16x32xf32>
    %cst_36 = arith.constant dense<0.000000e+00> : vector<16xf32>
    %153 = vector.multi_reduction <add>, %152, %cst_36 [1] : vector<16x32xf32> to vector<16xf32>
    %154 = vector.shape_cast %153 : vector<16xf32> to vector<16x1xf32>
    %cst_37 = arith.constant 3.200000e+01 : f32
    %155 = vector.broadcast %cst_37 : f32 to vector<16x1xf32>
    %156 = arith.divf %154, %155 : vector<16x1xf32>
    %157 = vector.broadcast %149 : vector<16x1xf32> to vector<16x32xf32>
    %158 = arith.subf %145, %157 : vector<16x32xf32>
    %cst_38 = arith.constant 9.99999974E-6 : f32
    %159 = vector.broadcast %cst_38 : f32 to vector<16x1xf32>
    %160 = arith.addf %156, %159 : vector<16x1xf32>
    %161 = math.rsqrt %160 : vector<16x1xf32>
    %162 = vector.broadcast %161 : vector<16x1xf32> to vector<16x32xf32>
    %163 = arith.mulf %158, %162 : vector<16x32xf32>
    %164 = vector.broadcast %8 : vector<1x32xf32> to vector<16x32xf32>
    %165 = arith.mulf %163, %164 : vector<16x32xf32>
    %166 = vector.broadcast %9 : vector<1x32xf32> to vector<16x32xf32>
    %167 = arith.addf %165, %166 : vector<16x32xf32>
    %c0_39 = arith.constant 0 : index
    %c0_40 = arith.constant 0 : index
    %168 = vector.load %arg8[%c0_39, %c0_40] : memref<16x32xf32, #tpu.memory_space<vmem>>, vector<16x32xf32>
    tpu.vector_store %arg8[%c0_39, %c0_40], %167 {strides = array<i32>} : memref<16x32xf32, #tpu.memory_space<vmem>>, vector<16x32xf32>,
    return
  }
}

</mosaic_0001>

<bundles_post_ra>
// kernel: tile.9
= control target key start
LH: loop header
LB: loop body
LE: loop exit
PB: predicated region body
PF: predicated region fallthrough
CT: control target
= control target key end

     0   :  { %vm68_vm0 = vcmask 1047556   ;;  %vm70_vm1 = vcmask 64512   ;;  %vm89_vm2 = vcmask 130112   ;;  %s195_s0 = inlined_call_operand.vmem [shape: f32[2,8,2,8], index: 0, kind: input, shape index: {}]   ;;  %s196_s1 = inlined_call_operand.vmem [shape: f32[16,16], index: 1, kind: output, shape index: {}]  }
   0x1   :  { %v110_v0 = vld [vmem:[%s195_s0 + $0xe] sm:$0x3]  ;;  %v111_v1 = vld [vmem:[%s195_s0 + $0xc] sm:$0x3]  ;;  %v112_v2 = vld [vmem:[%s195_s0 + $0xa] sm:$0x3] }
   0x2   :  { %39 = vst [vmem:[#allocation0 + $0x38] sm:$0x3] %v110_v0  ;;  %v113_v3 = vld [vmem:[%s195_s0 + $0x8] sm:$0x3]  ;;  %v114_v4 = vld [vmem:[%s195_s0 + $0x6] sm:$0x3] }
   0x3   :  { %43 = vst [vmem:[#allocation0 + $0x30] sm:$0x3] %v111_v1  ;;  %v115_v5 = vld [vmem:[%s195_s0 + $0x4] sm:$0x3]  ;;  %v116_v6 = vld [vmem:[%s195_s0 + $0x2] sm:$0x3] }
   0x4   :  { %47 = vst [vmem:[#allocation0 + $0x28] sm:$0x3] %v112_v2  ;;  %v64_v7 = vld [vmem:[%s195_s0] sm:$0x3]  ;;  %v102_v8 = vld [vmem:[%s195_s0 + $0x1e] sm:$0x3] }
   0x5   :  { %51 = vst [vmem:[#allocation0 + $0x20] sm:$0x3] %v113_v3  ;;  %v103_v9 = vld [vmem:[%s195_s0 + $0x1c] sm:$0x3]  ;;  %v104_v10 = vld [vmem:[%s195_s0 + $0x1a] sm:$0x3] }
   0x6   :  { %55 = vst [vmem:[#allocation0 + $0x18] sm:$0x3] %v114_v4  ;;  %v105_v11 = vld [vmem:[%s195_s0 + $0x18] sm:$0x3]  ;;  %v106_v12 = vld [vmem:[%s195_s0 + $0x16] sm:$0x3] }
   0x7   :  { %59 = vst [vmem:[#allocation0 + $0x10] sm:$0x3] %v115_v5  ;;  %v107_v13 = vld [vmem:[%s195_s0 + $0x14] sm:$0x3]  ;;  %v108_v14 = vld [vmem:[%s195_s0 + $0x12] sm:$0x3] }
   0x8   :  { %63 = vst [vmem:[#allocation0 + $0x8] sm:$0x3] %v116_v6  ;;  %v109_v15 = vld [vmem:[%s195_s0 + $0x10] sm:$0x3]  ;;  %s120_s0 = smov 8  }
   0x9   :  { %65 = vst [vmem:[#allocation0] sm:$0x3] %v64_v7 }
   0xa   :  { %7 = vst [vmem:[#allocation0 + $0x78] sm:$0x3] %v102_v8 }
   0xb   :  { %11 = vst [vmem:[#allocation0 + $0x70] sm:$0x3] %v103_v9 }
   0xc   :  { %15 = vst [vmem:[#allocation0 + $0x68] sm:$0x3] %v104_v10  ;;  %v84_v16 = vld [vmem:[#allocation0 + $0x1] ss:$8 sm:$0xf0]  }
   0xd   :  { %19 = vst [vmem:[#allocation0 + $0x60] sm:$0x3] %v105_v11  ;;  %v67_v23 = vld [vmem:[#allocation0] ss:$8 sm:$0xf0]  }
   0xe   :  { %23 = vst [vmem:[#allocation0 + $0x58] sm:$0x3] %v106_v12 }
   0xf   :  { %27 = vst [vmem:[#allocation0 + $0x50] sm:$0x3] %v107_v13 }
  0x10   :  { %v82_v17 = vld [vmem:[#allocation0 + $0x1] ss:$8 sm:$0xf]   ;;  %31 = vst [vmem:[#allocation0 + $0x48] sm:$0x3] %v108_v14 }
  0x11   :  { %v86_v18 = vsel %vm68_vm0, %v84_v16, %v82_v17  ;;  %35 = vst [vmem:[#allocation0 + $0x40] sm:$0x3] %v109_v15  ;;  %v66_v22 = vld [vmem:[#allocation0] ss:$8 sm:$0xf]  }
  0x12   :  { %87 = vrot.lane.b32.xlu0 %v86_v18, %s120_s0  ;;  %v69_v24 = vsel %vm68_vm0, %v67_v23, %v66_v22 }
  0x13   :  { %71 = vst.msk [vmem:[%s196_s1] sm:$0xff] %vm70_vm1, %v69_v24  }
  0x14   :  { %v94_v19 = vld [vmem:[#allocation0 + $0x41] ss:$8 sm:$0xf0]   ;;  %v75_v26 = vld [vmem:[#allocation0 + $0x40] ss:$8 sm:$0xf0]  }
  0x18   :  { %v92_v20 = vld [vmem:[#allocation0 + $0x41] ss:$8 sm:$0xf]   ;;  %v73_v25 = vld [vmem:[#allocation0 + $0x40] ss:$8 sm:$0xf]  }
  0x19   :  { %v96_v21 = vsel %vm68_vm0, %v94_v19, %v92_v20  ;;  %v77_v27 = vsel %vm68_vm0, %v75_v26, %v73_v25 }
  0x1a   :  { %97 = vrot.lane.b32.xlu0 %v96_v21, %s120_s0  ;;  %117 = vst.msk [vmem:[%s196_s1 + $0x8] sm:$0xff] %vm70_vm1, %v77_v27  }
  0x84   :  { %v88_v28 = vpop.permute.xlu0 %87  }
  0x85   :  { %90 = vst.msk [vmem:[%s196_s1] sm:$0xff] %vm89_vm2, %v88_v28  }
  0x8c   :  { %v98_v29 = vpop.permute.xlu0 %97  }
  0x8d   :  { %118 = vst.msk [vmem:[%s196_s1 + $0x8] sm:$0xff] %vm89_vm2, %v98_v29  }

// kernel: tile.8
= control target key start
LH: loop header
LB: loop body
LE: loop exit
PB: predicated region body
PF: predicated region fallthrough
CT: control target
= control target key end

     0   :  { %s154_s0 = inlined_call_operand.vmem [shape: f32[8,8], index: 0, kind: input, shape index: {}]   ;;  %s155_s1 = inlined_call_operand.vmem [shape: f32[2,8,2,8], index: 1, kind: output, shape index: {}]  }
   0x1   :  { %v4_v0 = vld [vmem:[%s154_s0] ss:$0 sm:$0xff]  ;;  %v51_v1 = vld [vmem:[%s154_s0 + $0x1] ss:$0 sm:$0xff]  ;;  %v54_v2 = vld [vmem:[%s154_s0 + $0x2] ss:$0 sm:$0xff] }
   0x2   :  { %5 = vst [vmem:[%s155_s1] sm:$0x3] %v4_v0  ;;  %v57_v3 = vld [vmem:[%s154_s0 + $0x3] ss:$0 sm:$0xff]  ;;  %v60_v4 = vld [vmem:[%s154_s0 + $0x4] ss:$0 sm:$0xff] }
   0x3   :  { %50 = vst [vmem:[%s155_s1 + $0x10] sm:$0x3] %v4_v0  ;;  %v63_v5 = vld [vmem:[%s154_s0 + $0x5] ss:$0 sm:$0xff]  ;;  %v66_v6 = vld [vmem:[%s154_s0 + $0x6] ss:$0 sm:$0xff] }
   0x4   :  { %52 = vst [vmem:[%s155_s1 + $0x2] sm:$0x3] %v51_v1  ;;  %v69_v7 = vld [vmem:[%s154_s0 + $0x7] ss:$0 sm:$0xff] }
   0x5   :  { %53 = vst [vmem:[%s155_s1 + $0x12] sm:$0x3] %v51_v1 }
   0x6   :  { %55 = vst [vmem:[%s155_s1 + $0x4] sm:$0x3] %v54_v2 }
   0x7   :  { %56 = vst [vmem:[%s155_s1 + $0x14] sm:$0x3] %v54_v2 }
   0x8   :  { %58 = vst [vmem:[%s155_s1 + $0x6] sm:$0x3] %v57_v3 }
   0x9   :  { %59 = vst [vmem:[%s155_s1 + $0x16] sm:$0x3] %v57_v3 }
   0xa   :  { %61 = vst [vmem:[%s155_s1 + $0x8] sm:$0x3] %v60_v4 }
   0xb   :  { %62 = vst [vmem:[%s155_s1 + $0x18] sm:$0x3] %v60_v4 }
   0xc   :  { %64 = vst [vmem:[%s155_s1 + $0xa] sm:$0x3] %v63_v5 }
   0xd   :  { %65 = vst [vmem:[%s155_s1 + $0x1a] sm:$0x3] %v63_v5 }
   0xe   :  { %67 = vst [vmem:[%s155_s1 + $0xc] sm:$0x3] %v66_v6 }
   0xf   :  { %68 = vst [vmem:[%s155_s1 + $0x1c] sm:$0x3] %v66_v6 }
  0x10   :  { %70 = vst [vmem:[%s155_s1 + $0xe] sm:$0x3] %v69_v7 }
  0x11   :  { %71 = vst [vmem:[%s155_s1 + $0x1e] sm:$0x3] %v69_v7 }

// kernel: decoder_block_forward.1
= control target key start
LH: loop header
LB: loop body
LE: loop exit
PB: predicated region body
PF: predicated region fallthrough
CT: control target
= control target key end

     0   :  { %s1248_s13 = smov 32   ;;  %s1852_s0 = inlined_call_operand.vmem [shape: f32[16,32], index: 0, kind: input, shape index: {}]   ;;  %s1853_s1 = inlined_call_operand.vmem [shape: f32[16,16], index: 1, kind: input, shape index: {}]   ;;  %s1854_s2 = inlined_call_operand.vmem [shape: f32[32,96], index: 2, kind: input, shape index: {}]   ;;  %s1855_s3 = inlined_call_operand.vmem [shape: f32[32,32], index: 3, kind: input, shape index: {}]   ;;  %s1856_s4 = inlined_call_operand.vmem [shape: f32[4,8,8], index: 4, kind: input, shape index: {}]   ;;  %s1857_s5 = inlined_call_operand.vmem [shape: f32[32,64], index: 5, kind: input, shape index: {}]   ;;  %s1858_s6 = inlined_call_operand.vmem [shape: f32[64,32], index: 6, kind: input, shape index: {}]   ;;  %s1859_s7 = inlined_call_operand.vmem [shape: f32[4,96], index: 7, kind: input, shape index: {}]   ;;  %s1860_s8 = inlined_call_operand.hbm [shape: f32[16,32], index: 8, kind: output, shape index: {}]  }
   0x1   :  { %v36_v0 = vld [vmem:[%s1854_s2 + $0x18] sm:$0xff]  ;;  %v35_v1 = vld [vmem:[%s1854_s2 + $0x10] sm:$0xff]  ;;  %v99_v2 = vld [vmem:[%s1856_s4 + $0x8] sm:$0xff] }
   0x2   :  { %57 = vmatpush.msra.mxu0 %v36_v0  ;;  %v34_v3 = vld [vmem:[%s1854_s2 + $0x8] sm:$0xff]  ;;  %108 = vrot.lane.b32.xlu0 %v99_v2, %s1248_s13 }
   0x4   :  { %58 = vmatpush.msra.mxu0 %v35_v1 }
   0x5   :  { %13 = vsyncpa [#allocation3], 0  ;;  %v33_v4 = vld [vmem:[%s1854_s2] sm:$0xff]  ;;  %vm38_vm0 = vcmask 261120   ;;  %v100_v6 = vld [vmem:[%s1856_s4 + $0x10] sm:$0xff]  ;;  %s1249_s23 = smov 96   ;;  %v271_v57 = vlaneseq }
   0x6   :  { %59 = vmatpush.msra.mxu0 %v34_v3  ;;  %v30_v5 = vld [vmem:[%s1852_s0] sm:$0xff]  ;;  %v31_v7 = vld [vmem:[%s1852_s0 + $0x8] sm:$0xff]  ;;  %v101_v8 = vld [vmem:[%s1856_s4 + $0x18] sm:$0xff]  ;;  %s1250_s26 = smov 120   ;;  %s1251_s27 = smov 112   ;;  %vm120_vm1 = vcmask 64512  }
   0x7   :  { %v1347_v10 = vld [vmem:[%s1859_s7] sm:$0xf]  ;;  %s1252_s28 = smov 104   ;;  %s1254_s9 = smov 113   ;;  %v272_v59 = vshrl.u32 %v271_v57, 7  ;;  %vm340_vm2 = vcmask 7168  }
   0x8   :  { %60 = vmatpush.msra.mxu0 %v33_v4  ;;  %v37_v11 = vperm.slane %v1347_v10, 0  ;;  %v98_v22 = vld [vmem:[%s1856_s4] sm:$0xff]  ;;  %s1253_s4 = smov 105   ;;  %s1255_s10 = smov 122   ;;  %vm441_vm5 = vcmask 15360   ;;  %vm518_vm8 = vcmask 31744  }
   0x9   :  { %1103 = vmatmul.msk.f32.vlgmr.msra.gmra.mxu0 %vm38_vm0, %v30_v5  ;;  %v274_v60 = vand.u32 7, %v272_v59  ;;  %s1256_s11 = smov 2   ;;  %s1257_s12 = smov 124   ;;  %vm593_vm11 = vcmask 130048   ;;  %vm850_vm12 = vcmask 195584  }
   0xa   :  { %110 = vrot.lane.b32.xlu0 %v100_v6, %s1248_s13  ;;  %v273_v6 = vadd.s32 8, %v272_v59  ;;  %s1259_s14 = smov 8   ;;  %s1261_s19 = smov 24  }
   0xb   :  { %v276_v61 = vadd.s32 1, %v274_v60  ;;  %s1262_s20 = smov 16  }
   0xd   :  { %v1503_v63 = vand.u32 7, %v276_v61 }
   0xf   :  { %v280_v0 = vand.u32 1, %v1503_v63 }
  0x11   :  { %1104 = vmatmul.msk.f32.gmra.mxu0 %vm38_vm0, %v31_v7  ;;  %vm1508_vm3 = vcmp.ne.s32.totalorder %v280_v0, 0 }
  0x12   :  { %112 = vrot.lane.b32.xlu0 %v101_v8, %s1248_s13  ;;  %v275_v8 = vand.u32 7, %v273_v6 }
  0x74   :  { %v109_v9 = vpop.permute.xlu0 %108 }
  0x75   :  { %158 = vrot.lane.b32.xlu0 %v109_v9, %s1249_s23 }
  0x7c   :  { %v111_v17 = vpop.permute.xlu0 %110 }
  0x84   :  { %v113_v28 = vpop.permute.xlu0 %112 }
  0x86   :  { %v62_v12 = vpop.f32.mrf.mxu0 }
  0x87   :  { %v1350_v13 = vadd.f32 %v62_v12, %v37_v11 }
  0x89   :  { %86 = vrot.lane.b32.xlu2 %v1350_v13, %s1250_s26  ;;  %v1355_v14 = vmul.f32 0.35355338, %v1350_v13 }
  0x8b   :  { %72 = vrot.lane.b32.xlu0 %v1355_v14, %s1250_s26 }
  0x8e   :  { %v65_v15 = vpop.f32.mrf.mxu0 }
  0x8f   :  { %v1359_v16 = vadd.f32 %v65_v15, %v37_v11  ;;  %v277_v15 = vadd.s32 1, %v275_v8 }
  0x91   :  { %88 = vrot.lane.b32.xlu1 %v1359_v16, %s1250_s26  ;;  %90 = vrot.lane.b32.xlu2 %v1350_v13, %s1251_s27  ;;  %v69_v25 = vmul.f32 0.35355338, %v1359_v16 }
  0x99   :  { %92 = vrot.lane.b32.xlu1 %v1359_v16, %s1251_s27  ;;  %94 = vrot.lane.b32.xlu2 %v1350_v13, %s1252_s28 }
  0xa1   :  { %96 = vrot.lane.b32.xlu1 %v1359_v16, %s1252_s28 }
  0xa9   :  { %197 = vrot.lane.b32.xlu1 %v111_v17, %s1249_s23 }
  0xb1   :  { %76 = vrot.lane.b32.xlu1 %v1355_v14, %s1251_s27 }
  0xe3   :  { %v1374_v18 = vpop.permute.xlu2 %86 }
  0xe4   :  { %154 = vrot.lane.b32.xlu1 %v1374_v18, %s1249_s23 }
  0xe7   :  { %v159_v30 = vpop.permute.xlu0 %158 }
  0xe8   :  { %1110 = vmatpush.xpose.msk.msra.mxu2 %vm120_vm1, %v159_v30 }
  0xeb   :  { %v1378_v19 = vpop.permute.xlu2 %90 }
  0xec   :  { %v1162_v20 = vpack.i.bf16 %v1378_v19, %v1374_v18  ;;  %193 = vrot.lane.b32.xlu2 %v1378_v19, %s1249_s23 }
  0xf3   :  { %v1399_v26 = vpop.permute.xlu2 %94 }
  0xfd   :  { %v73_v36 = vpop.permute.xlu0 %72 }
 0x103   :  { %v1384_v21 = vpop.permute.xlu1 %88 }
 0x104   :  { %156 = vrot.lane.b32.xlu2 %v1384_v21, %s1249_s23 }
 0x10b   :  { %v1391_v23 = vpop.permute.xlu1 %92 }
 0x10c   :  { %v1157_v24 = vpack.i.bf16 %v1391_v23, %v1384_v21  ;;  %106 = vrot.lane.b32.xlu2 %v98_v22, %s1248_s13  ;;  %195 = vrot.lane.b32.xlu0 %v1391_v23, %s1249_s23  ;;  %v1526_v22 = vand.u32 7, %v277_v15  ;;  %s1258_s13 = smov 4  }
 0x113   :  { %v1401_v27 = vpop.permute.xlu1 %96 }
 0x114   :  { %v1167_v29 = vpack.i.bf16 %v1399_v26, %v1401_v27  ;;  %74 = vrot.lane.b32.xlu2 %v69_v25, %s1250_s26  ;;  %234 = vrot.lane.b32.xlu1 %v1401_v27, %s1249_s23 }
 0x115   :  { %236 = vrot.lane.b32.xlu0 %v113_v28, %s1249_s23 }
 0x11b   :  { %v198_v31 = vpop.permute.xlu1 %197 }
 0x11c   :  { %80 = vrot.lane.b32.xlu2 %v1355_v14, %s1252_s28  ;;  %232 = vrot.lane.b32.xlu1 %v1399_v26, %s1249_s23 }
 0x11d   :  { %78 = vrot.lane.b32.xlu0 %v69_v25, %s1251_s27  ;;  %1115 = vmatpush.xpose.msk.msra.mxu3 %vm120_vm1, %v198_v31  ;;  %v281_v31 = vand.u32 1, %v1526_v22 }
 0x11f   :  { %vm1534_vm4 = vcmp.ne.s32.totalorder %v281_v31, 0 }
 0x123   :  { %v77_v33 = vpop.permute.xlu1 %76 }
 0x124   :  { %116 = vrot.lane.b32.xlu2 %v1359_v16, %s1249_s23 }
 0x125   :  { %82 = vrot.lane.b32.xlu0 %v69_v25, %s1252_s28 }
 0x12d   :  { %114 = vrot.lane.b32.xlu0 %v1350_v13, %s1249_s23 }
 0x146   :  { %v194_v32 = vpop.permute.xlu2 %193 }
 0x156   :  { %v155_v35 = vpop.permute.xlu1 %154 }
 0x15e   :  { %v157_v34 = vpop.permute.xlu2 %156 }
 0x15f   :  { %1111 = vmatpush.xpose.msk.msra.mxu2 %vm120_vm1, %v157_v34 }
 0x163   :  { %1112 = vmatpush.xpose.msk.msra.mxu2 %vm120_vm1, %v155_v35 }
 0x166   :  { %v107_v37 = vpop.permute.xlu2 %106  ;;  %1113 = vmatmul.msk.f32.vlgmr.msra.gmra.mxu2 %vm120_vm1, %v73_v36 }
 0x167   :  { %118 = vrot.lane.b32.xlu1 %v107_v37, %s1249_s23 }
 0x16e   :  { %v75_v38 = vpop.permute.xlu2 %74 }
 0x16f   :  { %1114 = vmatmul.msk.f32.gmra.mxu2 %vm120_vm1, %v75_v38 }
 0x176   :  { %v81_v44 = vpop.permute.xlu2 %80 }
 0x17e   :  { %v196_v39 = vpop.permute.xlu0 %195  ;;  %v117_v47 = vpop.permute.xlu2 %116 }
 0x17f   :  { %1116 = vmatpush.xpose.msk.msra.mxu3 %vm120_vm1, %v196_v39 }
 0x183   :  { %1117 = vmatpush.xpose.msk.msra.mxu3 %vm120_vm1, %v194_v32 }
 0x186   :  { %v235_v40 = vpop.permute.xlu1 %234  ;;  %1118 = vmatmul.msk.f32.vlgmr.msra.gmra.mxu3 %vm120_vm1, %v77_v33 }
 0x187   :  { %v237_v41 = vpop.permute.xlu0 %236 }
 0x188   :  { %1120 = vmatpush.xpose.msk.msrb.mxu0 %vm120_vm1, %v237_v41 }
 0x18c   :  { %1121 = vmatpush.xpose.msk.msrb.mxu0 %vm120_vm1, %v235_v40 }
 0x18e   :  { %v233_v42 = vpop.permute.xlu1 %232 }
 0x18f   :  { %v79_v43 = vpop.permute.xlu0 %78 }
 0x190   :  { %1119 = vmatmul.msk.f32.gmra.mxu3 %vm120_vm1, %v79_v43  ;;  %1122 = vmatpush.xpose.msk.msrb.mxu0 %vm120_vm1, %v233_v42 }
 0x193   :  { %1123 = vmatmul.msk.f32.vlgmr.msrb.gmra.mxu0 %vm120_vm1, %v81_v44 }
 0x197   :  { %v83_v45 = vpop.permute.xlu0 %82 }
 0x19b   :  { %1124 = vmatmul.msk.f32.gmra.mxu0 %vm120_vm1, %v83_v45 }
 0x19f   :  { %v115_v48 = vpop.permute.xlu0 %114 }
 0x1d9   :  { %v119_v46 = vpop.permute.xlu1 %118 }
 0x1da   :  { %1105 = vmatpush.xpose.msk.msra.mxu1 %vm120_vm1, %v119_v46 }
 0x1de   :  { %1106 = vmatpush.xpose.msk.msra.mxu1 %vm120_vm1, %v117_v47 }
 0x1e2   :  { %1107 = vmatpush.xpose.msk.msra.mxu1 %vm120_vm1, %v115_v48 }
 0x1e5   :  { %1108 = vmatmul.msk.f32.vlgmr.msra.gmra.mxu1 %vm120_vm1, %v1355_v14 }
 0x1e9   :  { %v1453_v51 = vpop.f32.mrf.mxu2 }
 0x1ed   :  { %1109 = vmatmul.msk.f32.gmra.mxu1 %vm120_vm1, %v69_v25 }
 0x1f2   :  { %v1463_v53 = vpop.f32.mrf.mxu2 }
 0x209   :  { %v1441_v49 = vpop.f32.mrf.mxu3 }
 0x20a   :  { %300 = vrot.lane.b32.xlu0 %v1441_v49, %s1253_s4 }
 0x210   :  { %v1445_v50 = vpop.f32.mrf.mxu0 }
 0x211   :  { %328 = vrot.lane.b32.xlu1 %v1445_v50, %s1254_s9  ;;  %304 = vrot.lane.b32.xlu2 %v1445_v50, %s1253_s4 }
 0x212   :  { %357 = vrot.lane.b32.xlu0 %v1441_v49, %s1251_s27 }
 0x213   :  { %v1479_v54 = vpop.f32.mrf.mxu3 }
 0x218   :  { %v1455_v52 = vpop.f32.mrf.mxu0 }
 0x219   :  { %296 = vrot.lane.b32.xlu1 %v1453_v51, %s1253_s4  ;;  %361 = vrot.lane.b32.xlu2 %v1445_v50, %s1251_s27 }
 0x21a   :  { %363 = vrot.lane.b32.xlu0 %v1455_v52, %s1251_s27 }
 0x221   :  { %324 = vrot.lane.b32.xlu1 %v1441_v49, %s1254_s9  ;;  %320 = vrot.lane.b32.xlu2 %v1453_v51, %s1254_s9 }
 0x222   :  { %322 = vrot.lane.b32.xlu0 %v1463_v53, %s1254_s9 }
 0x229   :  { %353 = vrot.lane.b32.xlu2 %v1453_v51, %s1251_s27  ;;  %306 = vrot.lane.b32.xlu1 %v1455_v52, %s1253_s4 }
 0x231   :  { %330 = vrot.lane.b32.xlu2 %v1455_v52, %s1254_s9  ;;  %298 = vrot.lane.b32.xlu1 %v1463_v53, %s1253_s4 }
 0x239   :  { %302 = vrot.lane.b32.xlu2 %v1479_v54, %s1253_s4  ;;  %355 = vrot.lane.b32.xlu1 %v1463_v53, %s1251_s27 }
 0x262   :  { %v1485_v55 = vpop.f32.mrf.mxu1 }
 0x263   :  { %349 = vrot.lane.b32.xlu1 %v1485_v55, %s1251_s27  ;;  %316 = vrot.lane.b32.xlu0 %v1485_v55, %s1254_s9 }
 0x264   :  { %292 = vrot.lane.b32.xlu2 %v1485_v55, %s1253_s4 }
 0x26a   :  { %v1493_v56 = vpop.f32.mrf.mxu1 }
 0x26b   :  { %326 = vrot.lane.b32.xlu0 %v1479_v54, %s1254_s9  ;;  %351 = vrot.lane.b32.xlu1 %v1493_v56, %s1251_s27  ;;  %v305_v58 = vpop.permute.xlu2 %304 }
 0x26c   :  { %294 = vrot.lane.b32.xlu2 %v1493_v56, %s1253_s4 }
 0x273   :  { %318 = vrot.lane.b32.xlu0 %v1493_v56, %s1254_s9  ;;  %v362_v62 = vpop.permute.xlu2 %361  ;;  %s1091_s9 = sshll.u32 %s1860_s8, 4  ;;  %s1092_s9 = int_to_ptr.hbm [resolvable:$true] %s1091_s9 }
 0x27b   :  { %359 = vrot.lane.b32.xlu0 %v1479_v54, %s1251_s27  ;;  %v321_v1 = vpop.permute.xlu2 %320 }
 0x27c   :  { %v301_v7 = vpop.permute.xlu0 %300 }
 0x283   :  { %v329_v3 = vpop.permute.xlu1 %328  ;;  %v354_v11 = vpop.permute.xlu2 %353 }
 0x284   :  { %v347_v4 = vsel %vm340_vm2, %v305_v58, %v329_v3  ;;  %v358_v17 = vpop.permute.xlu0 %357 }
 0x285   :  { %v1515_v5 = vsel %vm1508_vm3, %v347_v4, %v362_v62 }
 0x286   :  { %405 = vrot.lane.b32.xlu0 %v1515_v5, %s1255_s10  ;;  %429 = vrot.lane.b32.xlu2 %v1515_v5, %s1256_s11 }
 0x28b   :  { %v297_v9 = vpop.permute.xlu1 %296  ;;  %v331_v33 = vpop.permute.xlu2 %330 }
 0x28c   :  { %v343_v12 = vsel %vm340_vm2, %v297_v9, %v321_v1  ;;  %v364_v35 = vpop.permute.xlu0 %363  ;;  %v381_v1 = vand.u32 2, %v1503_v63 }
 0x28d   :  { %v375_v14 = vsel %vm1508_vm3, %v343_v12, %v354_v11 }
 0x28e   :  { %397 = vrot.lane.b32.xlu1 %v375_v14, %s1255_s10  ;;  %421 = vrot.lane.b32.xlu2 %v375_v14, %s1256_s11  ;;  %vm1563_vm6 = vcmp.ne.s32.totalorder %v381_v1, 0 }
 0x293   :  { %v325_v25 = vpop.permute.xlu1 %324  ;;  %v303_v43 = vpop.permute.xlu2 %302 }
 0x294   :  { %v345_v28 = vsel %vm340_vm2, %v301_v7, %v325_v25  ;;  %v323_v39 = vpop.permute.xlu0 %322 }
 0x295   :  { %v377_v30 = vsel %vm1508_vm3, %v345_v28, %v358_v17 }
 0x296   :  { %425 = vrot.lane.b32.xlu1 %v377_v30, %s1256_s11  ;;  %401 = vrot.lane.b32.xlu0 %v377_v30, %s1255_s10 }
 0x29b   :  { %v307_v34 = vpop.permute.xlu1 %306 }
 0x29c   :  { %v348_v36 = vsel %vm340_vm2, %v307_v34, %v331_v33 }
 0x29d   :  { %v380_v37 = vsel %vm1534_vm4, %v348_v36, %v364_v35 }
 0x29e   :  { %431 = vrot.lane.b32.xlu0 %v380_v37, %s1256_s11 }
 0x2a3   :  { %v299_v38 = vpop.permute.xlu1 %298 }
 0x2a4   :  { %v344_v40 = vsel %vm340_vm2, %v299_v38, %v323_v39 }
 0x2ab   :  { %v356_v41 = vpop.permute.xlu1 %355 }
 0x2ac   :  { %v376_v42 = vsel %vm1534_vm4, %v344_v40, %v356_v41 }
 0x2ad   :  { %423 = vrot.lane.b32.xlu1 %v376_v42, %s1256_s11  ;;  %399 = vrot.lane.b32.xlu2 %v376_v42, %s1255_s10 }
 0x2b5   :  { %407 = vrot.lane.b32.xlu2 %v380_v37, %s1255_s10 }
 0x2be   :  { %v293_v44 = vpop.permute.xlu2 %292 }
 0x2c6   :  { %v295_v59 = vpop.permute.xlu2 %294 }
 0x2d5   :  { %v350_v45 = vpop.permute.xlu1 %349  ;;  %v317_v46 = vpop.permute.xlu0 %316 }
 0x2d6   :  { %v341_v47 = vsel %vm340_vm2, %v293_v44, %v317_v46 }
 0x2d7   :  { %v373_v48 = vsel %vm1508_vm3, %v341_v47, %v350_v45 }
 0x2d8   :  { %417 = vrot.lane.b32.xlu0 %v373_v48, %s1256_s11  ;;  %393 = vrot.lane.b32.xlu2 %v373_v48, %s1255_s10 }
 0x2dd   :  { %v327_v57 = vpop.permute.xlu0 %326  ;;  %v352_v2 = vpop.permute.xlu1 %351 }
 0x2de   :  { %v346_v60 = vsel %vm340_vm2, %v303_v43, %v327_v57 }
 0x2e0   :  { %v430_v3 = vpop.permute.xlu2 %429 }
 0x2e5   :  { %v319_v58 = vpop.permute.xlu0 %318 }
 0x2e6   :  { %v342_v0 = vsel %vm340_vm2, %v295_v59, %v319_v58 }
 0x2e7   :  { %v374_v4 = vsel %vm1534_vm4, %v342_v0, %v352_v2  ;;  %v458_v0 = vand.u32 4, %v1503_v63 }
 0x2e8   :  { %v422_v11 = vpop.permute.xlu2 %421 }
 0x2e9   :  { %vm1625_vm9 = vcmp.ne.s32.totalorder %v458_v0, 0 }
 0x2ed   :  { %v360_v61 = vpop.permute.xlu0 %359 }
 0x2ee   :  { %v378_v62 = vsel %vm1534_vm4, %v346_v60, %v360_v61 }
 0x2ef   :  { %427 = vrot.lane.b32.xlu1 %v378_v62, %s1256_s11  ;;  %403 = vrot.lane.b32.xlu0 %v378_v62, %s1255_s10 }
 0x2f7   :  { %395 = vrot.lane.b32.xlu1 %v374_v4, %s1255_s10  ;;  %s1265_s10 = smov 128  }
 0x2f8   :  { %v406_v7 = vpop.permute.xlu0 %405 }
 0x2f9   :  { %v448_v8 = vsel %vm441_vm5, %v406_v7, %v430_v3 }
 0x2fa   :  { %v456_v9 = vsel %vm1563_vm6, %v448_v8, %v1515_v5 }
 0x2fb   :  { %482 = vrot.lane.b32.xlu2 %v456_v9, %s1257_s12 }
 0x2ff   :  { %506 = vrot.lane.b32.xlu1 %v456_v9, %s1258_s13 }
 0x300   :  { %v398_v12 = vpop.permute.xlu1 %397 }
 0x301   :  { %v444_v15 = vsel %vm441_vm5, %v398_v12, %v422_v11 }
 0x302   :  { %v452_v17 = vsel %vm1563_vm6, %v444_v15, %v375_v14  ;;  %v382_v14 = vand.u32 2, %v1526_v22 }
 0x303   :  { %498 = vrot.lane.b32.xlu2 %v452_v17, %s1258_s13 }
 0x304   :  { %vm1589_vm7 = vcmp.ne.s32.totalorder %v382_v14, 0 }
 0x307   :  { %v400_v25 = vpop.permute.xlu2 %399  ;;  %474 = vrot.lane.b32.xlu1 %v452_v17, %s1257_s12 }
 0x308   :  { %v426_v28 = vpop.permute.xlu1 %425  ;;  %v402_v5 = vpop.permute.xlu0 %401 }
 0x309   :  { %v446_v31 = vsel %vm441_vm5, %v402_v5, %v426_v28 }
 0x30a   :  { %v1581_v32 = vsel %vm1563_vm6, %v446_v31, %v377_v30 }
 0x30b   :  { %419 = vrot.lane.b32.xlu2 %v374_v4, %s1256_s11  ;;  %478 = vrot.lane.b32.xlu0 %v1581_v32, %s1257_s12 }
 0x30f   :  { %v408_v33 = vpop.permute.xlu2 %407  ;;  %502 = vrot.lane.b32.xlu1 %v1581_v32, %s1258_s13 }
 0x310   :  { %v432_v35 = vpop.permute.xlu0 %431 }
 0x311   :  { %v449_v36 = vsel %vm441_vm5, %v408_v33, %v432_v35 }
 0x312   :  { %v457_v30 = vsel %vm1589_vm7, %v449_v36, %v380_v37 }
 0x313   :  { %484 = vrot.lane.b32.xlu0 %v457_v30, %s1257_s12 }
 0x31f   :  { %v424_v38 = vpop.permute.xlu1 %423 }
 0x320   :  { %v445_v39 = vsel %vm441_vm5, %v400_v25, %v424_v38 }
 0x321   :  { %v1600_v40 = vsel %vm1589_vm7, %v445_v39, %v376_v42 }
 0x322   :  { %476 = vrot.lane.b32.xlu1 %v1600_v40, %s1257_s12  ;;  %500 = vrot.lane.b32.xlu0 %v1600_v40, %s1258_s13 }
 0x32a   :  { %508 = vrot.lane.b32.xlu1 %v457_v30, %s1258_s13 }
 0x332   :  { %v394_v41 = vpop.permute.xlu2 %393 }
 0x34a   :  { %v418_v43 = vpop.permute.xlu0 %417 }
 0x34b   :  { %v442_v37 = vsel %vm441_vm5, %v394_v41, %v418_v43 }
 0x34c   :  { %v450_v44 = vsel %vm1563_vm6, %v442_v37, %v373_v48 }
 0x34d   :  { %470 = vrot.lane.b32.xlu1 %v450_v44, %s1257_s12 }
 0x355   :  { %v483_v45 = vpop.permute.xlu2 %482 }
 0x35d   :  { %v499_v42 = vpop.permute.xlu2 %498 }
 0x361   :  { %v428_v46 = vpop.permute.xlu1 %427  ;;  %v404_v47 = vpop.permute.xlu0 %403 }
 0x362   :  { %v447_v57 = vsel %vm441_vm5, %v404_v47, %v428_v46 }
 0x363   :  { %v1614_v58 = vsel %vm1589_vm7, %v447_v57, %v378_v62 }
 0x364   :  { %480 = vrot.lane.b32.xlu2 %v1614_v58, %s1257_s12 }
 0x365   :  { %v420_v59 = vpop.permute.xlu2 %419 }
 0x369   :  { %v396_v60 = vpop.permute.xlu1 %395 }
 0x36a   :  { %v443_v61 = vsel %vm441_vm5, %v396_v60, %v420_v59  ;;  %vm996_vm5 = vcmask 523264  }
 0x36b   :  { %v451_v48 = vsel %vm1589_vm7, %v443_v61, %v374_v4 }
 0x36c   :  { %472 = vrot.lane.b32.xlu0 %v451_v48, %s1257_s12  ;;  %496 = vrot.lane.b32.xlu1 %v451_v48, %s1258_s13 }
 0x36d   :  { %494 = vrot.lane.b32.xlu2 %v450_v44, %s1258_s13 }
 0x371   :  { %v507_v1 = vpop.permute.xlu1 %506 }
 0x372   :  { %v525_v2 = vsel %vm518_vm8, %v483_v45, %v507_v1 }
 0x373   :  { %v1632_v3 = vsel %vm1625_vm9, %v525_v2, %v456_v9  ;;  %v459_v9 = vand.u32 4, %v1526_v22  ;;  %v584_v2 = vld [vmem:[%s1853_s1 + $0x8] sm:$0xff] }
 0x374   :  { %555 = vrot.lane.b32.xlu1 %v1632_v3, %s1259_s14 }
 0x375   :  { %vm1643_vm10 = vcmp.ne.s32.totalorder %v459_v9, 0 }
 0x379   :  { %v475_v4 = vpop.permute.xlu1 %474 }
 0x37a   :  { %v521_v63 = vsel %vm518_vm8, %v475_v4, %v499_v42 }
 0x37b   :  { %v529_v6 = vsel %vm1625_vm9, %v521_v63, %v452_v17 }
 0x37c   :  { %547 = vrot.lane.b32.xlu2 %v529_v6, %s1259_s14 }
 0x37d   :  { %v479_v7 = vpop.permute.xlu0 %478 }
 0x381   :  { %v503_v8 = vpop.permute.xlu1 %502 }
 0x382   :  { %v523_v11 = vsel %vm518_vm8, %v479_v7, %v503_v8 }
 0x383   :  { %v531_v41 = vsel %vm1625_vm9, %v523_v11, %v1581_v32  ;;  %v583_v32 = vld [vmem:[%s1853_s1] sm:$0xff]  ;;  %s1260_s1 = smov 64  }
 0x385   :  { %v485_v15 = vpop.permute.xlu0 %484 }
 0x394   :  { %v477_v12 = vpop.permute.xlu1 %476  ;;  %v501_v35 = vpop.permute.xlu0 %500 }
 0x395   :  { %v522_v43 = vsel %vm518_vm8, %v477_v12, %v501_v35 }
 0x396   :  { %v530_v37 = vsel %vm1643_vm10, %v522_v43, %v1600_v40 }
 0x39c   :  { %v509_v25 = vpop.permute.xlu1 %508 }
 0x39d   :  { %v526_v28 = vsel %vm518_vm8, %v485_v15, %v509_v25 }
 0x39e   :  { %v1649_v17 = vsel %vm1643_vm10, %v526_v28, %v457_v30 }
 0x39f   :  { %557 = vrot.lane.b32.xlu2 %v1649_v17, %s1259_s14 }
 0x3be   :  { %v481_v31 = vpop.permute.xlu2 %480 }
 0x3bf   :  { %v471_v14 = vpop.permute.xlu1 %470 }
 0x3c7   :  { %v495_v33 = vpop.permute.xlu2 %494 }
 0x3c8   :  { %v519_v22 = vsel %vm518_vm8, %v471_v14, %v495_v33 }
 0x3c9   :  { %v527_v34 = vsel %vm1625_vm9, %v519_v22, %v450_v44 }
 0x3ca   :  { %543 = vrot.lane.b32.xlu0 %v527_v34, %s1259_s14 }
 0x3d2   :  { %504 = vrot.lane.b32.xlu0 %v1614_v58, %s1258_s13 }
 0x3d6   :  { %v548_v44 = vpop.permute.xlu2 %547 }
 0x3d7   :  { %v569_v47 = vsel %vm120_vm1, %v529_v6, %v548_v44 }
 0x3d8   :  { %v577_v59 = vadd.f32 %v569_v47, %v1453_v51 }
 0x3de   :  { %v497_v36 = vpop.permute.xlu1 %496  ;;  %v473_v30 = vpop.permute.xlu0 %472 }
 0x3df   :  { %v520_v38 = vsel %vm518_vm8, %v473_v30, %v497_v36 }
 0x3e0   :  { %v528_v39 = vsel %vm1643_vm10, %v520_v38, %v451_v48  ;;  %v587_v48 = vadd.f32 %v583_v32, %v577_v59 }
 0x3e1   :  { %545 = vrot.lane.b32.xlu0 %v528_v39, %s1259_s14 }
 0x3e2   :  { %v600_v0 = vsel %vm593_vm11, %v587_v48, -inf }
 0x3e6   :  { %v556_v6 = vpop.permute.xlu1 %555 }
 0x3e7   :  { %v573_v8 = vsel %vm120_vm1, %v1632_v3, %v556_v6 }
 0x3e8   :  { %v581_v12 = vadd.f32 %v573_v8, %v1445_v50 }
 0x3e9   :  { %551 = vrot.lane.b32.xlu0 %v531_v41, %s1259_s14 }
 0x3ea   :  { %v591_v25 = vadd.f32 %v583_v32, %v581_v12 }
 0x3f1   :  { %549 = vrot.lane.b32.xlu0 %v530_v37, %s1259_s14 }
 0x3f9   :  { %v558_v14 = vpop.permute.xlu2 %557 }
 0x3fa   :  { %v574_v33 = vsel %vm120_vm1, %v1649_v17, %v558_v14 }
 0x43c   :  { %v544_v45 = vpop.permute.xlu0 %543 }
 0x43d   :  { %v567_v42 = vsel %vm120_vm1, %v527_v34, %v544_v45 }
 0x43e   :  { %v575_v46 = vadd.f32 %v567_v42, %v1485_v55 }
 0x440   :  { %v1678_v57 = vadd.f32 %v583_v32, %v575_v46 }
 0x442   :  { %v594_v40 = vsel %vm593_vm11, %v1678_v57, -inf }
 0x443   :  { %595 = vmax.xlane.f32.xlu1 %v594_v40 }
 0x444   :  { %v505_v60 = vpop.permute.xlu0 %504 }
 0x445   :  { %v524_v61 = vsel %vm518_vm8, %v481_v31, %v505_v60  ;;  %v612_v31 = vsel %vm593_vm11, %v591_v25, -inf }
 0x446   :  { %v532_v55 = vsel %vm1643_vm10, %v524_v61, %v1614_v58 }
 0x447   :  { %553 = vrot.lane.b32.xlu2 %v532_v55, %s1259_s14 }
 0x44b   :  { %601 = vmax.xlane.f32.xlu1 %v600_v0 }
 0x453   :  { %v546_v62 = vpop.permute.xlu0 %545 }
 0x454   :  { %v568_v51 = vsel %vm120_vm1, %v528_v39, %v546_v62 }
 0x455   :  { %v576_v1 = vadd.f32 %v568_v51, %v1493_v56 }
 0x457   :  { %v1694_v4 = vadd.f32 %v584_v2, %v576_v1 }
 0x459   :  { %v597_v58 = vsel %vm593_vm11, %v1694_v4, -inf }
 0x45a   :  { %598 = vmax.xlane.f32.xlu0 %v597_v58 }
 0x45b   :  { %v552_v63 = vpop.permute.xlu0 %551 }
 0x45c   :  { %v571_v28 = vsel %vm120_vm1, %v531_v41, %v552_v63 }
 0x45d   :  { %v579_v5 = vadd.f32 %v571_v28, %v1441_v49 }
 0x45f   :  { %v589_v3 = vadd.f32 %v583_v32, %v579_v5 }
 0x461   :  { %v606_v50 = vsel %vm593_vm11, %v589_v3, -inf }
 0x463   :  { %v550_v7 = vpop.permute.xlu0 %549 }
 0x464   :  { %v570_v11 = vsel %vm120_vm1, %v530_v37, %v550_v7 }
 0x465   :  { %v578_v56 = vadd.f32 %v570_v11, %v1463_v53  ;;  %v582_v53 = vadd.f32 %v574_v33, %v1455_v52 }
 0x467   :  { %v588_v9 = vadd.f32 %v584_v2, %v578_v56  ;;  %v592_v22 = vadd.f32 %v584_v2, %v582_v53 }
 0x469   :  { %v603_v15 = vsel %vm593_vm11, %v588_v9, -inf  ;;  %v615_v49 = vsel %vm593_vm11, %v592_v22, -inf }
 0x46a   :  { %604 = vmax.xlane.f32.xlu0 %v603_v15  ;;  %v1172_v15 = vpack.i.bf16 %v1350_v13, %v1359_v16 }
 0x470   :  { %613 = vmax.xlane.f32.xlu2 %v612_v31 }
 0x478   :  { %607 = vmax.xlane.f32.xlu2 %v606_v50 }
 0x47e   :  { %1168 = vrot.lane.b32.xlu0 %v1167_v29, %s1260_s1 }
 0x480   :  { %616 = vmax.xlane.f32.xlu2 %v615_v49 }
 0x4a1   :  { %v554_v34 = vpop.permute.xlu2 %553 }
 0x4a2   :  { %v572_v35 = vsel %vm120_vm1, %v532_v55, %v554_v34 }
 0x4a3   :  { %v580_v17 = vadd.f32 %v572_v35, %v1479_v54 }
 0x4a5   :  { %v590_v36 = vadd.f32 %v584_v2, %v580_v17 }
 0x4a7   :  { %v609_v52 = vsel %vm593_vm11, %v590_v36, -inf }
 0x4a8   :  { %610 = vmax.xlane.f32.xlu1 %v609_v52 }
 0x4b6   :  { %v596_v30 = vpop.xlane.xlu1 %595 }
 0x4b7   :  { %v618_v11 = vsub.f32 %v1678_v57, %v596_v30 }
 0x4b9   :  { %v626_v56 = vmul.f32 1.442695, %v618_v11 }
 0x4be   :  { %v602_v38 = vpop.xlane.xlu1 %601 }
 0x4bf   :  { %v620_v39 = vsub.f32 %v587_v48, %v602_v38 }
 0x4c1   :  { %v630_v41 = vmul.f32 1.442695, %v620_v39 }
 0x4c3   :  { %1177 = vpow2.f32 %v630_v41 }
 0x4c9   :  { %v1719_v43 = vpop.eup %1177 }
 0x4ca   :  { %v648_v26 = vsel %vm593_vm11, %v1719_v43, 0.0 }
 0x4cb   :  { %649 = vadd.xlane.f32.xlu2 %v648_v26 }
 0x4cd   :  { %v599_v27 = vpop.xlane.xlu0 %598 }
 0x4ce   :  { %v619_v28 = vsub.f32 %v1694_v4, %v599_v27 }
 0x4d0   :  { %v628_v57 = vmul.f32 1.442695, %v619_v28 }
 0x4dd   :  { %v605_v29 = vpop.xlane.xlu0 %604 }
 0x4de   :  { %v621_v37 = vsub.f32 %v588_v9, %v605_v29 }
 0x4e0   :  { %v632_v44 = vmul.f32 1.442695, %v621_v37 }
 0x4e2   :  { %1179 = vpow2.f32 %v632_v44 }
 0x4e3   :  { %v614_v54 = vpop.xlane.xlu2 %613  ;;  %1158 = vrot.lane.b32.xlu2 %v1157_v24, %s1260_s1 }
 0x4e4   :  { %v624_v45 = vsub.f32 %v591_v25, %v614_v54 }
 0x4e6   :  { %v638_v42 = vmul.f32 1.442695, %v624_v45 }
 0x4e8   :  { %v1727_v46 = vpop.eup %1179  ;;  %1181 = vpow2.f32 %v638_v42 }
 0x4e9   :  { %v651_v47 = vsel %vm593_vm11, %v1727_v46, 0.0 }
 0x4ea   :  { %652 = vadd.xlane.f32.xlu0 %v651_v47 }
 0x4eb   :  { %v608_v32 = vpop.xlane.xlu2 %607 }
 0x4ec   :  { %v622_v59 = vsub.f32 %v589_v3, %v608_v32 }
 0x4ee   :  { %v1182_v40 = vpop.eup %1181  ;;  %v634_v60 = vmul.f32 1.442695, %v622_v59 }
 0x4ef   :  { %v660_v61 = vsel %vm593_vm11, %v1182_v40, 0.0 }
 0x4f0   :  { %1183 = vpow2.f32 %v634_v60  ;;  %661 = vadd.xlane.f32.xlu1 %v660_v61  ;;  %v1169_v55 = vpop.permute.xlu0 %1168 }
 0x4f1   :  { %v1170_v21 = vunpack.i.l.bf16 %v1169_v55  ;;  %v1171_v23 = vunpack.i.h.bf16 %v1169_v55  ;;  %v856_v55 = vld [vmem:[%s1855_s3 + $0x18] sm:$0xff] }
 0x4f3   :  { %813 = vmatpush.msra.mxu0 %v1170_v21  ;;  %v617_v48 = vpop.xlane.xlu2 %616  ;;  %v855_v21 = vld [vmem:[%s1855_s3 + $0x10] sm:$0xff] }
 0x4f4   :  { %v625_v62 = vsub.f32 %v592_v22, %v617_v48 }
 0x4f5   :  { %814 = vmatpush.msra.mxu0 %v1171_v23  ;;  %v854_v23 = vld [vmem:[%s1855_s3 + $0x8] sm:$0xff] }
 0x4f6   :  { %v1184_v24 = vpop.eup %1183  ;;  %v640_v51 = vmul.f32 1.442695, %v625_v62 }
 0x4f7   :  { %v654_v0 = vsel %vm593_vm11, %v1184_v24, 0.0 }
 0x4f8   :  { %655 = vadd.xlane.f32.xlu1 %v654_v0  ;;  %1185 = vpow2.f32 %v640_v51 }
 0x4fe   :  { %v1186_v1 = vpop.eup %1185 }
 0x4ff   :  { %v663_v2 = vsel %vm593_vm11, %v1186_v1, 0.0 }
 0x50c   :  { %664 = vadd.xlane.f32.xlu2 %v663_v2 }
 0x511   :  { %1163 = vrot.lane.b32.xlu1 %v1162_v20, %s1260_s1 }
 0x51b   :  { %v611_v58 = vpop.xlane.xlu1 %610 }
 0x51c   :  { %v623_v63 = vsub.f32 %v590_v36, %v611_v58 }
 0x51e   :  { %v636_v6 = vmul.f32 1.442695, %v623_v63 }
 0x520   :  { %1187 = vpow2.f32 %v636_v6 }
 0x521   :  { %1189 = vpow2.f32 %v626_v56 }
 0x522   :  { %1191 = vpow2.f32 %v628_v57 }
 0x526   :  { %v1188_v7 = vpop.eup %1187 }
 0x527   :  { %v657_v8 = vsel %vm593_vm11, %v1188_v7, 0.0  ;;  %v1190_v12 = vpop.eup %1189 }
 0x528   :  { %658 = vadd.xlane.f32.xlu0 %v657_v8  ;;  %v642_v9 = vsel %vm593_vm11, %v1190_v12, 0.0  ;;  %v1192_v5 = vpop.eup %1191 }
 0x529   :  { %v645_v14 = vsel %vm593_vm11, %v1192_v5, 0.0 }
 0x53b   :  { %643 = vadd.xlane.f32.xlu1 %v642_v9  ;;  %v857_v9 = vperm.slane %v1347_v10, 2  ;;  %v1263_v10 = vmov 32.0  }
 0x53c   :  { %1173 = vrot.lane.b32.xlu0 %v1172_v15, %s1260_s1 }
 0x53e   :  { %v650_v18 = vpop.xlane.xlu2 %649 }
 0x546   :  { %v1159_v19 = vpop.permute.xlu2 %1158 }
 0x547   :  { %v1160_v20 = vunpack.i.l.bf16 %v1159_v19  ;;  %v1161_v25 = vunpack.i.h.bf16 %v1159_v19  ;;  %v1219_v19 = vld [vmem:[%s1852_s0] sm:$0xff] }
 0x549   :  { %743 = vmatpush.msrb.mxu2 %v1160_v20  ;;  %778 = vmatpush.msrb.mxu3 %v1161_v25 }
 0x55d   :  { %v653_v50 = vpop.xlane.xlu0 %652 }
 0x563   :  { %v662_v31 = vpop.xlane.xlu1 %661 }
 0x564   :  { %1193 = vrcp.f32 %v662_v31 }
 0x565   :  { %1195 = vrcp.f32 %v650_v18 }
 0x566   :  { %646 = vadd.xlane.f32.xlu0 %v645_v14 }
 0x56a   :  { %v1194_v13 = vpop.eup %1193 }
 0x56b   :  { %v680_v16 = vmul.f32 %v1194_v13, %v1182_v40  ;;  %v656_v3 = vpop.xlane.xlu1 %655  ;;  %v1196_v53 = vpop.eup %1195 }
 0x56c   :  { %1197 = vrcp.f32 %v656_v3  ;;  %v676_v35 = vmul.f32 %v1196_v53, %v1719_v43 }
 0x56d   :  { %1131 = vmatmul.msk.f32.vlgmr.msra.gmra.mxu0 %vm593_vm11, %v680_v16 }
 0x572   :  { %v1198_v4 = vpop.eup %1197 }
 0x573   :  { %v678_v17 = vmul.f32 %v1198_v4, %v1184_v24  ;;  %v853_v24 = vld [vmem:[%s1855_s3] sm:$0xff] }
 0x57f   :  { %v665_v33 = vpop.xlane.xlu2 %664 }
 0x580   :  { %1199 = vrcp.f32 %v665_v33 }
 0x581   :  { %1201 = vrcp.f32 %v653_v50 }
 0x583   :  { %v1164_v22 = vpop.permute.xlu1 %1163 }
 0x584   :  { %v1165_v49 = vunpack.i.l.bf16 %v1164_v22  ;;  %v1166_v34 = vunpack.i.h.bf16 %v1164_v22 }
 0x586   :  { %v1200_v36 = vpop.eup %1199  ;;  %744 = vmatpush.msrb.mxu2 %v1165_v49  ;;  %779 = vmatpush.msrb.mxu3 %v1166_v34 }
 0x587   :  { %1127 = vmatmul.msk.f32.vlgmr.msrb.gmra.mxu2 %vm593_vm11, %v676_v35  ;;  %1129 = vmatmul.msk.f32.vlgmr.msrb.gmra.mxu3 %vm593_vm11, %v678_v17  ;;  %v681_v52 = vmul.f32 %v1200_v36, %v1186_v1  ;;  %v1202_v30 = vpop.eup %1201 }
 0x588   :  { %v677_v38 = vmul.f32 %v1202_v30, %v1727_v46 }
 0x589   :  { %1132 = vmatmul.msk.f32.gmra.mxu0 %vm593_vm11, %v681_v52 }
 0x58f   :  { %1128 = vmatmul.msk.f32.gmra.mxu2 %vm593_vm11, %v677_v38 }
 0x59b   :  { %v659_v39 = vpop.xlane.xlu0 %658 }
 0x59c   :  { %1203 = vrcp.f32 %v659_v39  ;;  %v954_v39 = vld [vmem:[%s1857_s5 + $0x18] sm:$0xff] }
 0x59d   :  { %974 = vmatpush.msra.mxu2 %v954_v39 }
 0x5a2   :  { %v1204_v41 = vpop.eup %1203 }
 0x5a3   :  { %v679_v43 = vmul.f32 %v1204_v41, %v1188_v7  ;;  %v953_v41 = vld [vmem:[%s1857_s5 + $0x10] sm:$0xff] }
 0x5a4   :  { %975 = vmatpush.msra.mxu2 %v953_v41 }
 0x5a5   :  { %1130 = vmatmul.msk.f32.gmra.mxu3 %vm593_vm11, %v679_v43  ;;  %v952_v43 = vld [vmem:[%s1857_s5 + $0x8] sm:$0xff] }
 0x5a6   :  { %976 = vmatpush.msra.mxu2 %v952_v43 }
 0x5ae   :  { %v644_v26 = vpop.xlane.xlu1 %643  ;;  %v1174_v27 = vpop.permute.xlu0 %1173 }
 0x5af   :  { %1205 = vrcp.f32 %v644_v26  ;;  %v1175_v29 = vunpack.i.l.bf16 %v1174_v27  ;;  %v1176_v37 = vunpack.i.h.bf16 %v1174_v27  ;;  %v951_v26 = vld [vmem:[%s1857_s5] sm:$0xff] }
 0x5b0   :  { %977 = vmatpush.msra.mxu2 %v951_v26 }
 0x5b1   :  { %708 = vmatpush.msrb.mxu1 %v1175_v29 }
 0x5b3   :  { %709 = vmatpush.msrb.mxu1 %v1176_v37 }
 0x5b5   :  { %v1206_v44 = vpop.eup %1205  ;;  %876 = vmatpush.msra.mxu1 %v856_v55 }
 0x5b6   :  { %v674_v54 = vmul.f32 %v1206_v44, %v1190_v12  ;;  %v994_v44 = vld [vmem:[%s1858_s6 + $0x38] sm:$0xff] }
 0x5b7   :  { %877 = vmatpush.msra.mxu1 %v855_v21  ;;  %1011 = vmatpush.msra.mxu3 %v994_v44 }
 0x5b8   :  { %1125 = vmatmul.msk.f32.vlgmr.msrb.gmra.mxu1 %vm593_vm11, %v674_v54  ;;  %v993_v54 = vld [vmem:[%s1858_s6 + $0x30] sm:$0xff] }
 0x5b9   :  { %878 = vmatpush.msra.mxu1 %v854_v23  ;;  %1012 = vmatpush.msra.mxu3 %v993_v54 }
 0x5bb   :  { %879 = vmatpush.msra.mxu1 %v853_v24 }
 0x5d9   :  { %v647_v45 = vpop.xlane.xlu0 %646 }
 0x5da   :  { %1207 = vrcp.f32 %v647_v45  ;;  %v992_v45 = vld [vmem:[%s1858_s6 + $0x28] sm:$0xff] }
 0x5db   :  { %1209 = vrcp.f32 %v1263_v10  ;;  %1013 = vmatpush.msra.mxu3 %v992_v45 }
 0x5e0   :  { %v1208_v42 = vpop.eup %1207 }
 0x5e1   :  { %v675_v46 = vmul.f32 %v1208_v42, %v1192_v5  ;;  %v1220_v5 = vld [vmem:[%s1852_s0 + $0x8] sm:$0xff]  ;;  %v1210_v13 = vpop.eup %1209 }
 0x5e2   :  { %v896_v16 = vmul.f32 32.0, %v1210_v13  ;;  %vm900_vm13 = vweird.f32 %v1210_v13 }
 0x5e3   :  { %1126 = vmatmul.msk.f32.gmra.mxu1 %vm593_vm11, %v675_v46 }
 0x5e4   :  { %v897_v3 = vsub.f32 1.0, %v896_v16 }
 0x5e6   :  { %v898_v33 = vmul.f32 %v1210_v13, %v897_v3 }
 0x5e8   :  { %v899_v53 = vadd.f32 %v1210_v13, %v898_v33 }
 0x5ea   :  { %v816_v47 = vpop.f32.mrf.mxu0  ;;  %v1786_v50 = vsel %vm900_vm13, %v1210_v13, %v899_v53 }
 0x5eb   :  { %840 = vrot.lane.b32.xlu0 %v816_v47, %s1261_s19  ;;  %v991_v47 = vld [vmem:[%s1858_s6 + $0x20] sm:$0xff] }
 0x5ec   :  { %1014 = vmatpush.msra.mxu3 %v991_v47 }
 0x606   :  { %v819_v40 = vpop.f32.mrf.mxu0 }
 0x60a   :  { %v746_v32 = vpop.f32.mrf.mxu2  ;;  %v781_v59 = vpop.f32.mrf.mxu3 }
 0x60b   :  { %832 = vrot.lane.b32.xlu1 %v781_v59, %s1262_s20  ;;  %824 = vrot.lane.b32.xlu2 %v746_v32, %s1259_s14 }
 0x612   :  { %v749_v60 = vpop.f32.mrf.mxu2 }
 0x613   :  { %826 = vrot.lane.b32.xlu2 %v749_v60, %s1259_s14  ;;  %842 = vrot.lane.b32.xlu1 %v819_v40, %s1261_s19  ;;  %v990_v40 = vld [vmem:[%s1858_s6 + $0x18] sm:$0xff] }
 0x614   :  { %1015 = vmatpush.msra.mxu3 %v990_v40 }
 0x628   :  { %v784_v61 = vpop.f32.mrf.mxu3 }
 0x629   :  { %834 = vrot.lane.b32.xlu2 %v784_v61, %s1262_s20 }
 0x635   :  { %v711_v0 = vpop.f32.mrf.mxu1 }
 0x65d   :  { %v841_v2 = vpop.permute.xlu0 %840 }
 0x660   :  { %v714_v6 = vpop.f32.mrf.mxu1 }
 0x665   :  { %v825_v48 = vpop.permute.xlu2 %824 }
 0x666   :  { %v846_v51 = vsel %vm120_vm1, %v711_v0, %v825_v48 }
 0x66d   :  { %v827_v62 = vpop.permute.xlu2 %826 }
 0x66e   :  { %v847_v7 = vsel %vm120_vm1, %v714_v6, %v827_v62 }
 0x67d   :  { %v833_v1 = vpop.permute.xlu1 %832 }
 0x67e   :  { %v848_v58 = vsel %vm593_vm11, %v846_v51, %v833_v1 }
 0x67f   :  { %v851_v63 = vsel %vm850_vm12, %v848_v58, %v841_v2 }
 0x680   :  { %1133 = vmatmul.msk.f32.vlgmr.msra.gmra.mxu1 %vm38_vm0, %v851_v63 }
 0x683   :  { %v835_v8 = vpop.permute.xlu2 %834 }
 0x684   :  { %v849_v11 = vsel %vm593_vm11, %v847_v7, %v835_v8 }
 0x685   :  { %v843_v56 = vpop.permute.xlu1 %842 }
 0x686   :  { %v852_v12 = vsel %vm850_vm12, %v849_v11, %v843_v56 }
 0x688   :  { %1134 = vmatmul.msk.f32.gmra.mxu1 %vm38_vm0, %v852_v12 }
 0x6fd   :  { %v881_v15 = vpop.f32.mrf.mxu1 }
 0x6fe   :  { %v882_v18 = vadd.f32 %v881_v15, %v857_v9  ;;  %v989_v15 = vld [vmem:[%s1858_s6 + $0x10] sm:$0xff] }
 0x6ff   :  { %1016 = vmatpush.msra.mxu3 %v989_v15 }
 0x700   :  { %v887_v20 = vadd.f32 %v1219_v19, %v882_v18  ;;  %v988_v18 = vld [vmem:[%s1858_s6 + $0x8] sm:$0xff]  ;;  %v987_v19 = vld [vmem:[%s1858_s6] sm:$0xff]  ;;  %s1264_s6 = smov [#allocation2]  }
 0x701   :  { %1017 = vmatpush.msra.mxu3 %v988_v18 }
 0x702   :  { %v889_v25 = vsel %vm38_vm0, %v887_v20, 0.0 }
 0x703   :  { %890 = vadd.xlane.f32.xlu2 %v889_v25  ;;  %1018 = vmatpush.msra.mxu3 %v987_v19 }
 0x705   :  { %v884_v28 = vpop.f32.mrf.mxu1 }
 0x706   :  { %v885_v57 = vadd.f32 %v884_v28, %v857_v9 }
 0x708   :  { %v888_v31 = vadd.f32 %v1220_v5, %v885_v57 }
 0x70a   :  { %v892_v14 = vsel %vm38_vm0, %v888_v31, 0.0 }
 0x70b   :  { %893 = vadd.xlane.f32.xlu0 %v892_v14 }
 0x71f   :  { %941 = vrot.lane.b32.xlu0 %v857_v9, %s1249_s23 }
 0x776   :  { %v891_v4 = vpop.xlane.xlu2 %890 }
 0x777   :  { %v902_v22 = vmul.f32 %v1786_v50, %v891_v4 }
 0x779   :  { %v904_v49 = vsub.f32 %v887_v20, %v902_v22  ;;  %v1221_v20 = vld [vmem:[%s1859_s7] sm:$0xf]  ;;  %s1089_s7 = sshll.u32 %s1264_s6, 4  ;;  %s1090_s7 = int_to_ptr.vmem [resolvable:$true] %s1089_s7 }
 0x77a   :  { %v995_v25 = vperm.slane %v1221_v20, 3  ;;  %v955_v28 = vperm.slane %v1221_v20, 1 }
 0x77b   :  { %v906_v34 = vmul.f32 %v904_v49, %v904_v49 }
 0x77d   :  { %v908_v35 = vsel %vm38_vm0, %v906_v34, 0.0 }
 0x77e   :  { %909 = vadd.xlane.f32.xlu1 %v908_v35  ;;  %v894_v17 = vpop.xlane.xlu0 %893 }
 0x77f   :  { %v903_v36 = vmul.f32 %v1786_v50, %v894_v17 }
 0x781   :  { %v905_v52 = vsub.f32 %v888_v31, %v903_v36 }
 0x783   :  { %v907_v30 = vmul.f32 %v905_v52, %v905_v52 }
 0x785   :  { %v911_v38 = vsel %vm38_vm0, %v907_v30, 0.0 }
 0x786   :  { %912 = vadd.xlane.f32.xlu2 %v911_v38 }
 0x791   :  { %v942_v62 = vpop.permute.xlu0 %941 }
 0x797   :  { %946 = vrot.lane.b32.xlu1 %v857_v9, %s1260_s1 }
 0x79f   :  { %1073 = vrot.lane.b32.xlu1 %v995_v25, %s1249_s23 }
 0x7f1   :  { %v910_v27 = vpop.xlane.xlu1 %909 }
 0x7f2   :  { %v914_v29 = vmul.f32 %v910_v27, %v1786_v50 }
 0x7f4   :  { %v916_v37 = vadd.f32 1e-05, %v914_v29 }
 0x7f6   :  { %1211 = vrsqrt.f32 %v916_v37  ;;  %vm924_vm15 = vweird.f32 %v916_v37 }
 0x7f9   :  { %v913_v42 = vpop.xlane.xlu2 %912 }
 0x7fa   :  { %v915_v46 = vmul.f32 %v913_v42, %v1786_v50 }
 0x7fc   :  { %v1212_v32 = vpop.eup %1211  ;;  %v917_v59 = vadd.f32 1e-05, %v915_v46 }
 0x7fd   :  { %v919_v60 = vmul.f32 %v1212_v32, %v916_v37  ;;  %vm925_vm14 = vweird.f32 %v1212_v32 }
 0x7fe   :  { %1213 = vrsqrt.f32 %v917_v59  ;;  %vm926_vm1 = vmor %vm924_vm15, %vm925_vm14  ;;  %vm934_vm3 = vweird.f32 %v917_v59 }
 0x7ff   :  { %v920_v61 = vmul.f32 %v1212_v32, %v919_v60 }
 0x801   :  { %v921_v55 = vmul.f32 0.5, %v920_v61 }
 0x803   :  { %v922_v21 = vsub.f32 1.5, %v921_v55 }
 0x804   :  { %v1214_v23 = vpop.eup %1213 }
 0x805   :  { %v929_v24 = vmul.f32 %v1214_v23, %v917_v59  ;;  %v923_v48 = vmul.f32 %v1212_v32, %v922_v21  ;;  %vm935_vm2 = vweird.f32 %v1214_v23 }
 0x806   :  { %vm936_vm4 = vmor %vm934_vm3, %vm935_vm2 }
 0x807   :  { %v930_v0 = vmul.f32 %v1214_v23, %v929_v24  ;;  %v927_v51 = vsel %vm926_vm1, %v1212_v32, %v923_v48 }
 0x808   :  { %v938_v1 = vmul.f32 %v927_v51, %v904_v49 }
 0x809   :  { %v931_v2 = vmul.f32 0.5, %v930_v0  ;;  %v947_v58 = vpop.permute.xlu1 %946 }
 0x80a   :  { %v944_v63 = vmul.f32 %v942_v62, %v938_v1 }
 0x80b   :  { %v932_v6 = vsub.f32 1.5, %v931_v2 }
 0x80c   :  { %v949_v7 = vadd.f32 %v947_v58, %v944_v63 }
 0x80d   :  { %v933_v8 = vmul.f32 %v1214_v23, %v932_v6 }
 0x80e   :  { %1135 = vmatmul.msk.f32.vlgmr.msra.gmra.mxu2 %vm38_vm0, %v949_v7 }
 0x80f   :  { %v937_v11 = vsel %vm936_vm4, %v1214_v23, %v933_v8 }
 0x810   :  { %v939_v56 = vmul.f32 %v937_v11, %v905_v52 }
 0x811   :  { %v1074_v23 = vpop.permute.xlu1 %1073 }
 0x812   :  { %v945_v12 = vmul.f32 %v942_v62, %v939_v56 }
 0x814   :  { %v950_v9 = vadd.f32 %v947_v58, %v945_v12 }
 0x816   :  { %1136 = vmatmul.msk.f32.gmra.mxu2 %vm38_vm0, %v950_v9 }
 0x891   :  { %v979_v57 = vpop.f32.mrf.mxu2 }
 0x892   :  { %v980_v5 = vadd.f32 %v979_v57, %v955_v28 }
 0x894   :  { %v985_v31 = vmax.f32 %v980_v5, 0.0 }
 0x896   :  { %1137 = vmatmul.msk.f32.vlgmr.msra.gmra.mxu3 %vm996_vm5, %v985_v31 }
 0x899   :  { %v982_v14 = vpop.f32.mrf.mxu2 }
 0x89a   :  { %v983_v10 = vadd.f32 %v982_v14, %v955_v28 }
 0x89c   :  { %v986_v13 = vmax.f32 %v983_v10, 0.0 }
 0x89e   :  { %1138 = vmatmul.msk.f32.gmra.mxu3 %vm996_vm5, %v986_v13 }
 0x919   :  { %v1020_v16 = vpop.f32.mrf.mxu3 }
 0x91a   :  { %v1021_v3 = vadd.f32 %v1020_v16, %v995_v25 }
 0x91c   :  { %v1026_v33 = vadd.f32 %v1021_v3, %v949_v7 }
 0x91e   :  { %v1028_v53 = vsel %vm38_vm0, %v1026_v33, 0.0 }
 0x91f   :  { %1029 = vadd.xlane.f32.xlu2 %v1028_v53 }
 0x921   :  { %v1023_v4 = vpop.f32.mrf.mxu3 }
 0x922   :  { %v1024_v22 = vadd.f32 %v1023_v4, %v995_v25 }
 0x924   :  { %v1027_v49 = vadd.f32 %v1024_v22, %v950_v9 }
 0x926   :  { %v1031_v34 = vsel %vm38_vm0, %v1027_v49, 0.0 }
 0x927   :  { %1032 = vadd.xlane.f32.xlu2 %v1031_v34 }
 0x992   :  { %v1030_v35 = vpop.xlane.xlu2 %1029 }
 0x993   :  { %v1034_v17 = vmul.f32 %v1030_v35, %v1786_v50 }
 0x995   :  { %v1036_v36 = vsub.f32 %v1026_v33, %v1034_v17 }
 0x997   :  { %v1038_v52 = vmul.f32 %v1036_v36, %v1036_v36 }
 0x999   :  { %v1040_v30 = vsel %vm38_vm0, %v1038_v52, 0.0 }
 0x99a   :  { %1041 = vadd.xlane.f32.xlu0 %v1040_v30  ;;  %v1033_v38 = vpop.xlane.xlu2 %1032 }
 0x99b   :  { %v1035_v39 = vmul.f32 %v1033_v38, %v1786_v50 }
 0x99d   :  { %v1037_v41 = vsub.f32 %v1027_v49, %v1035_v39 }
 0x99f   :  { %v1039_v43 = vmul.f32 %v1037_v41, %v1037_v41 }
 0x9a1   :  { %v1043_v26 = vsel %vm38_vm0, %v1039_v43, 0.0 }
 0x9a2   :  { %1044 = vadd.xlane.f32.xlu2 %v1043_v26 }
 0x9ba   :  { %1078 = vrot.lane.b32.xlu2 %v995_v25, %s1260_s1 }
 0xa0d   :  { %v1042_v27 = vpop.xlane.xlu0 %1041 }
 0xa0e   :  { %v1046_v29 = vmul.f32 %v1042_v27, %v1786_v50 }
 0xa10   :  { %v1048_v37 = vadd.f32 1e-05, %v1046_v29 }
 0xa12   :  { %1215 = vrsqrt.f32 %v1048_v37  ;;  %vm1056_vm7 = vweird.f32 %v1048_v37 }
 0xa15   :  { %v1045_v44 = vpop.xlane.xlu2 %1044 }
 0xa16   :  { %v1047_v54 = vmul.f32 %v1045_v44, %v1786_v50 }
 0xa18   :  { %v1216_v45 = vpop.eup %1215  ;;  %v1049_v42 = vadd.f32 1e-05, %v1047_v54 }
 0xa19   :  { %v1051_v46 = vmul.f32 %v1216_v45, %v1048_v37  ;;  %vm1057_vm6 = vweird.f32 %v1216_v45 }
 0xa1a   :  { %1217 = vrsqrt.f32 %v1049_v42  ;;  %vm1058_vm8 = vmor %vm1056_vm7, %vm1057_vm6  ;;  %vm1066_vm10 = vweird.f32 %v1049_v42 }
 0xa1b   :  { %v1052_v47 = vmul.f32 %v1216_v45, %v1051_v46 }
 0xa1d   :  { %v1053_v32 = vmul.f32 0.5, %v1052_v47  ;;  %v1079_v0 = vpop.permute.xlu2 %1078 }
 0xa1f   :  { %v1054_v59 = vsub.f32 1.5, %v1053_v32 }
 0xa20   :  { %v1218_v40 = vpop.eup %1217 }
 0xa21   :  { %v1061_v60 = vmul.f32 %v1218_v40, %v1049_v42  ;;  %v1055_v61 = vmul.f32 %v1216_v45, %v1054_v59  ;;  %vm1067_vm9 = vweird.f32 %v1218_v40 }
 0xa22   :  { %vm1068_vm11 = vmor %vm1066_vm10, %vm1067_vm9 }
 0xa23   :  { %v1062_v55 = vmul.f32 %v1218_v40, %v1061_v60  ;;  %v1059_v21 = vsel %vm1058_vm8, %v1216_v45, %v1055_v61 }
 0xa24   :  { %v1070_v24 = vmul.f32 %v1059_v21, %v1036_v36 }
 0xa25   :  { %v1063_v48 = vmul.f32 0.5, %v1062_v55 }
 0xa26   :  { %v1076_v50 = vmul.f32 %v1074_v23, %v1070_v24 }
 0xa27   :  { %v1064_v62 = vsub.f32 1.5, %v1063_v48 }
 0xa28   :  { %v1081_v51 = vadd.f32 %v1079_v0, %v1076_v50 }
 0xa29   :  { %v1065_v1 = vmul.f32 %v1218_v40, %v1064_v62 }
 0xa2a   :  { %1083 = vst.msk [vmem:[#allocation2] sm:$0xff] %vm38_vm0, %v1081_v51 }
 0xa2b   :  { %v1069_v2 = vsel %vm1068_vm11, %v1218_v40, %v1065_v1 }
 0xa2c   :  { %v1071_v58 = vmul.f32 %v1069_v2, %v1037_v41 }
 0xa2e   :  { %v1077_v63 = vmul.f32 %v1074_v23, %v1071_v58 }
 0xa30   :  { %v1082_v6 = vadd.f32 %v1079_v0, %v1077_v63 }
 0xa32   :  { %1084 = vst.msk [vmem:[#allocation2 + $0x8] sm:$0xff] %vm38_vm0, %v1082_v6 }
 0xa33   :  { %1097 = dma.vmem_to_hbm [thread:$0]  %s1090_s7, 256, %s1092_s9, [#allocation3], %s1265_s10, %s1265_s10, %s1259_s14  }
 0xa34   :  { %1246 = dma.done.wait [#allocation3], 256  }
 0xa35   :  { %1247 = vsyncadd [#allocation3], 4294967040 }
 0xa36   :  { %1102 = vsyncpa [#allocation3], 1 }

</bundles_post_ra>
